<compile_context>
chip_gen: v6e
topology: v6e:2x2x1
jax: 0.10.0
libtpu: 0.0.40
codegen_flags: <defaults>
</compile_context>

<pallas_src>
import functools
import math

import jax
import jax.numpy as jnp
from jax.experimental import pallas as pl
from jax.experimental.pallas import tpu as pltpu

# 48 MiB scoped VMEM: above the 16/32 MiB defaults but inside v7x's 64 MiB.
_VMEM_LIMIT = 48 * 1024 * 1024


def _cparams():
    return pltpu.CompilerParams(
        dimension_semantics=("parallel",),
        vmem_limit_bytes=_VMEM_LIMIT,
    )


# ---------------------------------------------------------------------------
# Kernel 1: conv1 (3x3 VALID) + bn1 + ReLU  AND  downsample (5x5 VALID) conv,
# fused so x is read from HBM once.  Layout (C, flat spatial) on lanes.
# ---------------------------------------------------------------------------
def _conv1_down_kernel(x_ref, w1_ref, s1_ref, t1_ref, wd_ref, bd_ref,
                       h1_ref, res_ref, *, rs, l1, lr):
    x = x_ref[0]                                            # (Cin, Lx) bf16
    # conv1: ONE (Cout, 9*Cin) x (9*Cin, L1) MXU dot; taps folded into K.
    slab1 = jnp.concatenate(
        [x[:, i * rs + j: i * rs + j + l1] for i in range(3) for j in range(3)],
        axis=0)
    h = jnp.dot(w1_ref[...], slab1, preferred_element_type=jnp.float32)
    h = jnp.maximum(h * s1_ref[...] + t1_ref[...], 0.0)     # folded bn1 + ReLU
    h1_ref[0] = h.astype(h1_ref.dtype)
    # downsample: ONE (Cout, 25*Cin) x (25*Cin, LR) MXU dot + bias.
    slabd = jnp.concatenate(
        [x[:, i * rs + j: i * rs + j + lr] for i in range(5) for j in range(5)],
        axis=0)
    r = jnp.dot(wd_ref[...], slabd, preferred_element_type=jnp.float32) + bd_ref[...]
    res_ref[0] = r.astype(res_ref.dtype)


def conv1_and_downsample(x_flat, w1_2d, s1, t1, wd_2d, bd, *, rs, l1, lr):
    n, cin, lx = x_flat.shape
    cout = w1_2d.shape[0]
    kernel = functools.partial(_conv1_down_kernel, rs=rs, l1=l1, lr=lr)
    return pl.pallas_call(
        kernel,
        grid=(n,),
        in_specs=[
            pl.BlockSpec((1, cin, lx), lambda i: (i, 0, 0)),
            pl.BlockSpec(w1_2d.shape, lambda i: (0, 0)),
            pl.BlockSpec(s1.shape, lambda i: (0, 0)),
            pl.BlockSpec(t1.shape, lambda i: (0, 0)),
            pl.BlockSpec(wd_2d.shape, lambda i: (0, 0)),
            pl.BlockSpec(bd.shape, lambda i: (0, 0)),
        ],
        out_specs=(
            pl.BlockSpec((1, cout, l1), lambda i: (i, 0, 0)),
            pl.BlockSpec((1, cout, lr), lambda i: (i, 0, 0)),
        ),
        out_shape=(
            jax.ShapeDtypeStruct((n, cout, l1), jnp.bfloat16),   # h1 (bf16 handoff)
            jax.ShapeDtypeStruct((n, cout, lr), jnp.bfloat16),   # residual
        ),
        compiler_params=_cparams(),
    )(x_flat, w1_2d, s1, t1, wd_2d, bd)


# ---------------------------------------------------------------------------
# Kernel 2: conv2 (3x3) + bn2 + CALayer + SpatialAttention (stats + 7x7 conv +
# sigmoid) + gating + residual add + final ReLU, fully fused.
# ---------------------------------------------------------------------------
def _conv2_ca_sa_kernel(h1_ref, res_ref, w2_ref, s2_ref, t2_ref,
                        caw1_ref, cab1_ref, caw2_ref, cab2_ref, alpha_ref,
                        wsa_ref, mask_ref, o_ref, *, rs, lr, inv_count):
    h1 = h1_ref[0]                                          # (C, L1) bf16
    # conv2 + bn2: ONE (C, 9C) x (9C, LR) MXU dot.
    slab = jnp.concatenate(
        [h1[:, i * rs + j: i * rs + j + lr] for i in range(3) for j in range(3)],
        axis=0)
    h2 = jnp.dot(w2_ref[...], slab, preferred_element_type=jnp.float32)
    h2 = h2 * s2_ref[...] + t2_ref[...]                     # (C, LR) f32
    mask = mask_ref[...]                                    # (1, LR): 1 on valid cols

    # CALayer: avg-pool(1) -> 1x1 -> PReLU -> 1x1 -> sigmoid ; out2 = (h2*y)*h2
    pooled = jnp.sum(h2 * mask, axis=1, keepdims=True) * inv_count        # (C, 1)
    t = jnp.dot(caw1_ref[...], pooled,
                preferred_element_type=jnp.float32) + cab1_ref[...]       # (Cr, 1)
    t = jnp.where(t >= 0.0, t, alpha_ref[...] * t)                        # PReLU
    yca = jax.nn.sigmoid(
        jnp.dot(caw2_ref[...], t,
                preferred_element_type=jnp.float32) + cab2_ref[...])      # (C, 1)
    out2 = (h2 * yca) * h2                                                # (C, LR)

    # SpatialAttention stats; junk columns zeroed so they double as the conv's
    # zero padding in the flat (row-stride = rs) frame.
    avg = jnp.mean(out2, axis=0, keepdims=True) * mask
    mx = jnp.max(out2, axis=0, keepdims=True) * mask
    zeros = jnp.zeros((2, 4 * rs), jnp.float32)
    ext = jnp.concatenate([zeros, jnp.concatenate([avg, mx], axis=0), zeros],
                          axis=1)                                         # (2, LR+8rs)
    # 7x7 / 2-channel conv as ONE lane-dense (1, 98) x (98, LR) dot.
    sa_slab = jnp.concatenate(
        [ext[:, (rs - 3) + i * rs + j: (rs - 3) + i * rs + j + lr]
         for i in range(7) for j in range(7)],
        axis=0)
    sa = jax.nn.sigmoid(
        jnp.dot(wsa_ref[...], sa_slab, preferred_element_type=jnp.float32))

    out = out2 * sa + res_ref[0].astype(jnp.float32)        # gate + residual add
    o_ref[0] = jnp.maximum(out, 0.0)                        # final ReLU


def conv2_ca_sa(h1, res, w2_2d, s2, t2, caw1, cab1, caw2, cab2, alpha, wsa,
                mask, *, rs, lr, valid_count):
    n, c, l1 = h1.shape
    kernel = functools.partial(_conv2_ca_sa_kernel, rs=rs, lr=lr,
                               inv_count=1.0 / float(valid_count))
    return pl.pallas_call(
        kernel,
        grid=(n,),
        in_specs=[
            pl.BlockSpec((1, c, l1), lambda i: (i, 0, 0)),
            pl.BlockSpec((1, c, lr), lambda i: (i, 0, 0)),
            pl.BlockSpec(w2_2d.shape, lambda i: (0, 0)),
            pl.BlockSpec(s2.shape, lambda i: (0, 0)),
            pl.BlockSpec(t2.shape, lambda i: (0, 0)),
            pl.BlockSpec(caw1.shape, lambda i: (0, 0)),
            pl.BlockSpec(cab1.shape, lambda i: (0, 0)),
            pl.BlockSpec(caw2.shape, lambda i: (0, 0)),
            pl.BlockSpec(cab2.shape, lambda i: (0, 0)),
            pl.BlockSpec(alpha.shape, lambda i: (0, 0)),
            pl.BlockSpec(wsa.shape, lambda i: (0, 0)),
            pl.BlockSpec(mask.shape, lambda i: (0, 0)),
        ],
        out_specs=pl.BlockSpec((1, c, lr), lambda i: (i, 0, 0)),
        out_shape=jax.ShapeDtypeStruct((n, c, lr), jnp.float32),
        compiler_params=_cparams(),
    )(h1, res, w2_2d, s2, t2, caw1, cab1, caw2, cab2, alpha, wsa, mask)


# ---------------------------------------------------------------------------
# BN folding (inference form), weight re-layout, and the full block forward.
# ---------------------------------------------------------------------------
def _fold_bn(conv_bias, bn, eps=1e-5):
    gamma, beta, mean, var = bn
    g = gamma * jax.lax.rsqrt(var + eps)
    return g, (conv_bias - mean) * g + beta


def _tapify(w):
    """(Cout, Cin, kh, kw) torch layout -> (Cout, kh*kw*Cin), tap-major."""
    co, ci, kh, kw = w.shape
    return jnp.transpose(w, (0, 2, 3, 1)).reshape(co, kh * kw * ci)


def cba_block_forward(x_nchw, p):
    """CBABlock forward (stride=1, downsample = 5x5 VALID conv inplane->plane)."""
    n, cin, h_in, w_in = x_nchw.shape
    plane = p["conv1_w"].shape[0]
    h_out, w_out = h_in - 4, w_in - 4            # two VALID 3x3 convs
    assert h_out > 0 and w_out > 0
    assert w_in - w_out >= 3, "flat-frame SA padding needs >=3 junk columns"

    rs = w_in                                     # row stride carried end-to-end
    lr = h_out * rs                               # residual / output flat length
    l1 = (h_out + 3) * rs                         # conv1 output flat length
    lx = (h_in + 2) * rs                          # zero-padded flat input length

    # NCHW -> (N, C, H*W) is a free reshape; append two zero rows for tap spill.
    x_flat = x_nchw.reshape(n, cin, h_in * w_in).astype(jnp.bfloat16)
    x_flat = jnp.pad(x_flat, ((0, 0), (0, 0), (0, lx - h_in * w_in)))

    s1, t1 = _fold_bn(p["conv1_b"], p["bn1"])
    s2, t2 = _fold_bn(p["conv2_b"], p["bn2"])

    h1, res = conv1_and_downsample(
        x_flat,
        _tapify(p["conv1_w"]).astype(jnp.bfloat16),
        s1.reshape(plane, 1).astype(jnp.float32),
        t1.reshape(plane, 1).astype(jnp.float32),
        _tapify(p["down_w"]).astype(jnp.bfloat16),
        p["down_b"].reshape(plane, 1).astype(jnp.float32),
        rs=rs, l1=l1, lr=lr)

    # validity mask over the flat frame (zeros on the rs - w_out junk columns)
    mask = ((jnp.arange(lr) % rs) < w_out).astype(jnp.float32).reshape(1, lr)
    # SA 7x7 weights ordered (tap-major, then [avg, max] channel)
    wsa = jnp.transpose(p["sa_w"], (2, 3, 1, 0)).reshape(1, 98).astype(jnp.float32)

    out_flat = conv2_ca_sa(
        h1, res,
        _tapify(p["conv2_w"]).astype(jnp.bfloat16),
        s2.reshape(plane, 1).astype(jnp.float32),
        t2.reshape(plane, 1).astype(jnp.float32),
        jnp.transpose(p["ca_w1"]).astype(jnp.float32),        # (Cr, C)
        p["ca_b1"].reshape(-1, 1).astype(jnp.float32),        # (Cr, 1)
        jnp.transpose(p["ca_w2"]).astype(jnp.float32),        # (C, Cr)
        p["ca_b2"].reshape(-1, 1).astype(jnp.float32),        # (C, 1)
        p["prelu_alpha"].reshape(1, 1).astype(jnp.float32),
        wsa, mask, rs=rs, lr=lr, valid_count=h_out * w_out)

    # flat (row stride = rs) -> NCHW valid region (already channel-first).
    return out_flat.reshape(n, plane, h_out, rs)[:, :, :, :w_out]


# ---------------------------------------------------------------------------
# Pure-JAX reference (same bf16 handoffs / operands) for a self-check.
# ---------------------------------------------------------------------------
def _ref_forward(x_nchw, p):
    x = jnp.transpose(x_nchw, (0, 2, 3, 1)).astype(jnp.float32)
    hi = jax.lax.Precision.HIGHEST

    def conv(v, w):
        return jax.lax.conv_general_dilated(
            v.astype(jnp.bfloat16),
            jnp.transpose(w, (2, 3, 1, 0)).astype(jnp.bfloat16),
            (1, 1), "VALID",
            dimension_numbers=("NHWC", "HWIO", "NHWC"),
            preferred_element_type=jnp.float32)

    s1, t1 = _fold_bn(p["conv1_b"], p["bn1"])
    h1 = jnp.maximum(conv(x, p["conv1_w"]) * s1 + t1, 0.0)
    h1 = h1.astype(jnp.bfloat16).astype(jnp.float32)          # matches bf16 handoff
    s2, t2 = _fold_bn(p["conv2_b"], p["bn2"])
    h2 = conv(h1, p["conv2_w"]) * s2 + t2
    pooled = jnp.mean(h2, axis=(1, 2), keepdims=True)
    t = jnp.einsum("nijc,cr->nijr", pooled, p["ca_w1"], precision=hi) + p["ca_b1"]
    t = jnp.where(t >= 0.0, t, p["prelu_alpha"] * t)
    yca = jax.nn.sigmoid(
        jnp.einsum("nijr,rc->nijc", t, p["ca_w2"], precision=hi) + p["ca_b2"])
    out2 = (h2 * yca) * h2
    stats = jnp.concatenate([jnp.mean(out2, -1, keepdims=True),
                             jnp.max(out2, -1, keepdims=True)], axis=-1)
    sa = jax.nn.sigmoid(jax.lax.conv_general_dilated(
        stats, jnp.transpose(p["sa_w"], (2, 3, 1, 0)).astype(jnp.float32),
        (1, 1), [(3, 3), (3, 3)],
        dimension_numbers=("NHWC", "HWIO", "NHWC"), precision=hi))
    res = conv(x, p["down_w"]) + p["down_b"]
    res = res.astype(jnp.bfloat16).astype(jnp.float32)        # matches bf16 handoff
    out = jnp.maximum(out2 * sa + res, 0.0)
    return jnp.transpose(out, (0, 3, 1, 2))


# ---------------------------------------------------------------------------
# Deterministic parameter init (PyTorch-default-style uniform, eval-mode BN)
# ---------------------------------------------------------------------------
def init_params(key, inplane, plane, reduction=2, sa_kernel=7):
    ks = list(jax.random.split(key, 24))

    def nxt():
        return ks.pop()

    def conv_init(cout, cin, k, bias=True):
        bound = 1.0 / math.sqrt(cin * k * k)
        w = jax.random.uniform(nxt(), (cout, cin, k, k), jnp.float32, -bound, bound)
        b = (jax.random.uniform(nxt(), (cout,), jnp.float32, -bound, bound)
             if bias else None)
        return w, b

    def bn_init(c):
        return (jax.random.uniform(nxt(), (c,), jnp.float32, 0.5, 1.5),    # gamma
                jax.random.uniform(nxt(), (c,), jnp.float32, -0.2, 0.2),   # beta
                jax.random.uniform(nxt(), (c,), jnp.float32, -0.2, 0.2),   # mean
                jax.random.uniform(nxt(), (c,), jnp.float32, 0.5, 1.5))    # var

    cr = plane // reduction
    w1, b1 = conv_init(plane, inplane, 3)
    bn1 = bn_init(plane)
    w2, b2 = conv_init(plane, plane, 3)
    bn2 = bn_init(plane)
    caw1 = jax.random.uniform(nxt(), (plane, cr), jnp.float32,
                              -1.0 / math.sqrt(plane), 1.0 / math.sqrt(plane))
    cab1 = jax.random.uniform(nxt(), (cr,), jnp.float32,
                              -1.0 / math.sqrt(plane), 1.0 / math.sqrt(plane))
    caw2 = jax.random.uniform(nxt(), (cr, plane), jnp.float32,
                              -1.0 / math.sqrt(cr), 1.0 / math.sqrt(cr))
    cab2 = jax.random.uniform(nxt(), (plane,), jnp.float32,
                              -1.0 / math.sqrt(cr), 1.0 / math.sqrt(cr))
    saw, _ = conv_init(1, 2, sa_kernel, bias=False)
    dw, db = conv_init(plane, inplane, 5)
    return {
        "conv1_w": w1, "conv1_b": b1, "bn1": bn1,
        "conv2_w": w2, "conv2_b": b2, "bn2": bn2,
        "ca_w1": caw1, "ca_b1": cab1, "ca_w2": caw2, "ca_b2": cab2,
        "prelu_alpha": jnp.array([0.25], jnp.float32),   # nn.PReLU() default
        "sa_w": saw,
        "down_w": dw, "down_b": db,
    }


if __name__ == "__main__":
    key = jax.random.PRNGKey(0)
    kx, kp = jax.random.split(key)
    N, inplane, plane, H, W = 2, 4, 8, 16, 16
    x = jax.random.normal(kx, (N, inplane, H, W), jnp.float32)
    params = init_params(kp, inplane, plane)

    fwd = jax.jit(cba_block_forward)
    out = jax.block_until_ready(fwd(x, params))

    ref = _ref_forward(x, params)
    assert out.shape == (N, plane, H - 4, W - 4), out.shape
    assert out.dtype == jnp.float32
    assert bool(jnp.all(jnp.isfinite(out)))
    err = float(jnp.max(jnp.abs(out - ref)))
    assert err < 1e-2, f"max |pallas - ref| = {err}"
    print("KERNEL_OK")
</pallas_src>

<mosaic_0001>
module attributes {stable_mosaic.version = 11 : i64} {
  func.func @_conv1_down_kernel(%arg0: i32, %arg1: memref<1x4x288xbf16, #tpu.memory_space<vmem>>, %arg2: memref<8x36xbf16, #tpu.memory_space<vmem>>, %arg3: memref<8x1xf32, #tpu.memory_space<vmem>>, %arg4: memref<8x1xf32, #tpu.memory_space<vmem>>, %arg5: memref<8x100xbf16, #tpu.memory_space<vmem>>, %arg6: memref<8x1xf32, #tpu.memory_space<vmem>>, %arg7: memref<1x8x240xbf16, #tpu.memory_space<vmem>>, %arg8: memref<1x8x192xbf16, #tpu.memory_space<vmem>>) attributes {dimension_semantics = [#tpu.dimension_semantics<parallel>], iteration_bounds = array<i64: 2>, scalar_prefetch = 0 : i64, scratch_operands = 0 : i64, tpu.core_type = #tpu.core_type<tc>, window_params = [{transform_indices = @transform_0, window_bounds = array<i64: 1, 4, 288>}, {pipeline_mode = #tpu.pipeline_mode<synchronous>, transform_indices = @transform_1, window_bounds = array<i64: 8, 36>}, {pipeline_mode = #tpu.pipeline_mode<synchronous>, transform_indices = @transform_2, window_bounds = array<i64: 8, 1>}, {pipeline_mode = #tpu.pipeline_mode<synchronous>, transform_indices = @transform_3, window_bounds = array<i64: 8, 1>}, {pipeline_mode = #tpu.pipeline_mode<synchronous>, transform_indices = @transform_4, window_bounds = array<i64: 8, 100>}, {pipeline_mode = #tpu.pipeline_mode<synchronous>, transform_indices = @transform_5, window_bounds = array<i64: 8, 1>}, {transform_indices = @transform_6, window_bounds = array<i64: 1, 8, 240>}, {transform_indices = @transform_7, window_bounds = array<i64: 1, 8, 192>}]} {
    %c0 = arith.constant 0 : index
    %c0_0 = arith.constant 0 : index
    %c0_1 = arith.constant 0 : index
    %0 = vector.load %arg1[%c0, %c0_0, %c0_1] : memref<1x4x288xbf16, #tpu.memory_space<vmem>>, vector<1x4x288xbf16>
    %1 = vector.shape_cast %0 : vector<1x4x288xbf16> to vector<4x288xbf16>
    %2 = vector.extract_strided_slice %1 {offsets = [0, 0], sizes = [4, 240], strides = [1, 1]} : vector<4x288xbf16> to vector<4x240xbf16>
    %3 = vector.extract_strided_slice %1 {offsets = [0, 1], sizes = [4, 240], strides = [1, 1]} : vector<4x288xbf16> to vector<4x240xbf16>
    %4 = vector.extract_strided_slice %1 {offsets = [0, 2], sizes = [4, 240], strides = [1, 1]} : vector<4x288xbf16> to vector<4x240xbf16>
    %5 = vector.extract_strided_slice %1 {offsets = [0, 16], sizes = [4, 240], strides = [1, 1]} : vector<4x288xbf16> to vector<4x240xbf16>
    %6 = vector.extract_strided_slice %1 {offsets = [0, 17], sizes = [4, 240], strides = [1, 1]} : vector<4x288xbf16> to vector<4x240xbf16>
    %7 = vector.extract_strided_slice %1 {offsets = [0, 18], sizes = [4, 240], strides = [1, 1]} : vector<4x288xbf16> to vector<4x240xbf16>
    %8 = vector.extract_strided_slice %1 {offsets = [0, 32], sizes = [4, 240], strides = [1, 1]} : vector<4x288xbf16> to vector<4x240xbf16>
    %9 = vector.extract_strided_slice %1 {offsets = [0, 33], sizes = [4, 240], strides = [1, 1]} : vector<4x288xbf16> to vector<4x240xbf16>
    %10 = vector.extract_strided_slice %1 {offsets = [0, 34], sizes = [4, 240], strides = [1, 1]} : vector<4x288xbf16> to vector<4x240xbf16>
    %11 = tpu.concatenate %2, %3, %4, %5, %6, %7, %8, %9, %10 in 0 : vector<4x240xbf16>, vector<4x240xbf16>, vector<4x240xbf16>, vector<4x240xbf16>, vector<4x240xbf16>, vector<4x240xbf16>, vector<4x240xbf16>, vector<4x240xbf16>, vector<4x240xbf16> -> vector<36x240xbf16>
    %c0_2 = arith.constant 0 : index
    %c0_3 = arith.constant 0 : index
    %12 = vector.load %arg2[%c0_2, %c0_3] : memref<8x36xbf16, #tpu.memory_space<vmem>>, vector<8x36xbf16>
    %cst = arith.constant dense<0.000000e+00> : vector<8x240xf32>
    %13 = tpu.matmul %12, %11, %cst {dimension_numbers = #tpu.dot_dimension_numbers<[1], [0], [0], [1], [0, 0, 1, 1], [], []>} : vector<8x36xbf16>, vector<36x240xbf16>, vector<8x240xf32> -> vector<8x240xf32>
    %c0_4 = arith.constant 0 : index
    %c0_5 = arith.constant 0 : index
    %14 = vector.load %arg3[%c0_4, %c0_5] : memref<8x1xf32, #tpu.memory_space<vmem>>, vector<8x1xf32>
    %15 = vector.broadcast %14 : vector<8x1xf32> to vector<8x240xf32>
    %16 = arith.mulf %13, %15 : vector<8x240xf32>
    %c0_6 = arith.constant 0 : index
    %c0_7 = arith.constant 0 : index
    %17 = vector.load %arg4[%c0_6, %c0_7] : memref<8x1xf32, #tpu.memory_space<vmem>>, vector<8x1xf32>
    %18 = vector.broadcast %17 : vector<8x1xf32> to vector<8x240xf32>
    %19 = arith.addf %16, %18 : vector<8x240xf32>
    %cst_8 = arith.constant 0.000000e+00 : f32
    %20 = vector.broadcast %cst_8 : f32 to vector<8x240xf32>
    %21 = arith.maximumf %19, %20 : vector<8x240xf32>
    %22 = arith.truncf %21 : vector<8x240xf32> to vector<8x240xbf16>
    %c0_9 = arith.constant 0 : index
    %c0_10 = arith.constant 0 : index
    %c0_11 = arith.constant 0 : index
    %23 = vector.load %arg7[%c0_9, %c0_10, %c0_11] : memref<1x8x240xbf16, #tpu.memory_space<vmem>>, vector<1x8x240xbf16>
    %24 = vector.shape_cast %23 : vector<1x8x240xbf16> to vector<8x240xbf16>
    %25 = vector.shape_cast %22 : vector<8x240xbf16> to vector<1x8x240xbf16>
    tpu.vector_store %arg7[%c0_9, %c0_10, %c0_11], %25 {strides = array<i32>} : memref<1x8x240xbf16, #tpu.memory_space<vmem>>, vector<1x8x240xbf16>,
    %26 = vector.extract_strided_slice %1 {offsets = [0, 0], sizes = [4, 192], strides = [1, 1]} : vector<4x288xbf16> to vector<4x192xbf16>
    %27 = vector.extract_strided_slice %1 {offsets = [0, 1], sizes = [4, 192], strides = [1, 1]} : vector<4x288xbf16> to vector<4x192xbf16>
    %28 = vector.extract_strided_slice %1 {offsets = [0, 2], sizes = [4, 192], strides = [1, 1]} : vector<4x288xbf16> to vector<4x192xbf16>
    %29 = vector.extract_strided_slice %1 {offsets = [0, 3], sizes = [4, 192], strides = [1, 1]} : vector<4x288xbf16> to vector<4x192xbf16>
    %30 = vector.extract_strided_slice %1 {offsets = [0, 4], sizes = [4, 192], strides = [1, 1]} : vector<4x288xbf16> to vector<4x192xbf16>
    %31 = vector.extract_strided_slice %1 {offsets = [0, 16], sizes = [4, 192], strides = [1, 1]} : vector<4x288xbf16> to vector<4x192xbf16>
    %32 = vector.extract_strided_slice %1 {offsets = [0, 17], sizes = [4, 192], strides = [1, 1]} : vector<4x288xbf16> to vector<4x192xbf16>
    %33 = vector.extract_strided_slice %1 {offsets = [0, 18], sizes = [4, 192], strides = [1, 1]} : vector<4x288xbf16> to vector<4x192xbf16>
    %34 = vector.extract_strided_slice %1 {offsets = [0, 19], sizes = [4, 192], strides = [1, 1]} : vector<4x288xbf16> to vector<4x192xbf16>
    %35 = vector.extract_strided_slice %1 {offsets = [0, 20], sizes = [4, 192], strides = [1, 1]} : vector<4x288xbf16> to vector<4x192xbf16>
    %36 = vector.extract_strided_slice %1 {offsets = [0, 32], sizes = [4, 192], strides = [1, 1]} : vector<4x288xbf16> to vector<4x192xbf16>
    %37 = vector.extract_strided_slice %1 {offsets = [0, 33], sizes = [4, 192], strides = [1, 1]} : vector<4x288xbf16> to vector<4x192xbf16>
    %38 = vector.extract_strided_slice %1 {offsets = [0, 34], sizes = [4, 192], strides = [1, 1]} : vector<4x288xbf16> to vector<4x192xbf16>
    %39 = vector.extract_strided_slice %1 {offsets = [0, 35], sizes = [4, 192], strides = [1, 1]} : vector<4x288xbf16> to vector<4x192xbf16>
    %40 = vector.extract_strided_slice %1 {offsets = [0, 36], sizes = [4, 192], strides = [1, 1]} : vector<4x288xbf16> to vector<4x192xbf16>
    %41 = vector.extract_strided_slice %1 {offsets = [0, 48], sizes = [4, 192], strides = [1, 1]} : vector<4x288xbf16> to vector<4x192xbf16>
    %42 = vector.extract_strided_slice %1 {offsets = [0, 49], sizes = [4, 192], strides = [1, 1]} : vector<4x288xbf16> to vector<4x192xbf16>
    %43 = vector.extract_strided_slice %1 {offsets = [0, 50], sizes = [4, 192], strides = [1, 1]} : vector<4x288xbf16> to vector<4x192xbf16>
    %44 = vector.extract_strided_slice %1 {offsets = [0, 51], sizes = [4, 192], strides = [1, 1]} : vector<4x288xbf16> to vector<4x192xbf16>
    %45 = vector.extract_strided_slice %1 {offsets = [0, 52], sizes = [4, 192], strides = [1, 1]} : vector<4x288xbf16> to vector<4x192xbf16>
    %46 = vector.extract_strided_slice %1 {offsets = [0, 64], sizes = [4, 192], strides = [1, 1]} : vector<4x288xbf16> to vector<4x192xbf16>
    %47 = vector.extract_strided_slice %1 {offsets = [0, 65], sizes = [4, 192], strides = [1, 1]} : vector<4x288xbf16> to vector<4x192xbf16>
    %48 = vector.extract_strided_slice %1 {offsets = [0, 66], sizes = [4, 192], strides = [1, 1]} : vector<4x288xbf16> to vector<4x192xbf16>
    %49 = vector.extract_strided_slice %1 {offsets = [0, 67], sizes = [4, 192], strides = [1, 1]} : vector<4x288xbf16> to vector<4x192xbf16>
    %50 = vector.extract_strided_slice %1 {offsets = [0, 68], sizes = [4, 192], strides = [1, 1]} : vector<4x288xbf16> to vector<4x192xbf16>
    %51 = tpu.concatenate %26, %27, %28, %29, %30, %31, %32, %33, %34, %35, %36, %37, %38, %39, %40, %41 in 0 : vector<4x192xbf16>, vector<4x192xbf16>, vector<4x192xbf16>, vector<4x192xbf16>, vector<4x192xbf16>, vector<4x192xbf16>, vector<4x192xbf16>, vector<4x192xbf16>, vector<4x192xbf16>, vector<4x192xbf16>, vector<4x192xbf16>, vector<4x192xbf16>, vector<4x192xbf16>, vector<4x192xbf16>, vector<4x192xbf16>, vector<4x192xbf16> -> vector<64x192xbf16>
    %52 = tpu.concatenate %42, %43, %44, %45, %46, %47, %48, %49, %50 in 0 : vector<4x192xbf16>, vector<4x192xbf16>, vector<4x192xbf16>, vector<4x192xbf16>, vector<4x192xbf16>, vector<4x192xbf16>, vector<4x192xbf16>, vector<4x192xbf16>, vector<4x192xbf16> -> vector<36x192xbf16>
    %53 = tpu.concatenate %51, %52 in 0 : vector<64x192xbf16>, vector<36x192xbf16> -> vector<100x192xbf16>
    %c0_12 = arith.constant 0 : index
    %c0_13 = arith.constant 0 : index
    %54 = vector.load %arg5[%c0_12, %c0_13] : memref<8x100xbf16, #tpu.memory_space<vmem>>, vector<8x100xbf16>
    %cst_14 = arith.constant dense<0.000000e+00> : vector<8x192xf32>
    %55 = tpu.matmul %54, %53, %cst_14 {dimension_numbers = #tpu.dot_dimension_numbers<[1], [0], [0], [1], [0, 0, 1, 1], [], []>} : vector<8x100xbf16>, vector<100x192xbf16>, vector<8x192xf32> -> vector<8x192xf32>
    %c0_15 = arith.constant 0 : index
    %c0_16 = arith.constant 0 : index
    %56 = vector.load %arg6[%c0_15, %c0_16] : memref<8x1xf32, #tpu.memory_space<vmem>>, vector<8x1xf32>
    %57 = vector.broadcast %56 : vector<8x1xf32> to vector<8x192xf32>
    %58 = arith.addf %55, %57 : vector<8x192xf32>
    %59 = arith.truncf %58 : vector<8x192xf32> to vector<8x192xbf16>
    %c0_17 = arith.constant 0 : index
    %c0_18 = arith.constant 0 : index
    %c0_19 = arith.constant 0 : index
    %60 = vector.load %arg8[%c0_17, %c0_18, %c0_19] : memref<1x8x192xbf16, #tpu.memory_space<vmem>>, vector<1x8x192xbf16>
    %61 = vector.shape_cast %60 : vector<1x8x192xbf16> to vector<8x192xbf16>
    %62 = vector.shape_cast %59 : vector<8x192xbf16> to vector<1x8x192xbf16>
    tpu.vector_store %arg8[%c0_17, %c0_18, %c0_19], %62 {strides = array<i32>} : memref<1x8x192xbf16, #tpu.memory_space<vmem>>, vector<1x8x192xbf16>,
    return
  }
  func.func @transform_0(%arg0: i32) -> (i32, i32, i32) {
    %c0_i32 = arith.constant 0 : i32
    %c0_i32_0 = arith.constant 0 : i32
    %c0_i32_1 = arith.constant 0 : i32
    return %arg0, %c0_i32, %c0_i32_0 : i32, i32, i32
  }
  func.func @transform_1(%arg0: i32) -> (i32, i32) {
    %c0_i32 = arith.constant 0 : i32
    %c0_i32_0 = arith.constant 0 : i32
    %c0_i32_1 = arith.constant 0 : i32
    return %c0_i32, %c0_i32_0 : i32, i32
  }
  func.func @transform_2(%arg0: i32) -> (i32, i32) {
    %c0_i32 = arith.constant 0 : i32
    %c0_i32_0 = arith.constant 0 : i32
    %c0_i32_1 = arith.constant 0 : i32
    return %c0_i32, %c0_i32_0 : i32, i32
  }
  func.func @transform_3(%arg0: i32) -> (i32, i32) {
    %c0_i32 = arith.constant 0 : i32
    %c0_i32_0 = arith.constant 0 : i32
    %c0_i32_1 = arith.constant 0 : i32
    return %c0_i32, %c0_i32_0 : i32, i32
  }
  func.func @transform_4(%arg0: i32) -> (i32, i32) {
    %c0_i32 = arith.constant 0 : i32
    %c0_i32_0 = arith.constant 0 : i32
    %c0_i32_1 = arith.constant 0 : i32
    return %c0_i32, %c0_i32_0 : i32, i32
  }
  func.func @transform_5(%arg0: i32) -> (i32, i32) {
    %c0_i32 = arith.constant 0 : i32
    %c0_i32_0 = arith.constant 0 : i32
    %c0_i32_1 = arith.constant 0 : i32
    return %c0_i32, %c0_i32_0 : i32, i32
  }
  func.func @transform_6(%arg0: i32) -> (i32, i32, i32) {
    %c0_i32 = arith.constant 0 : i32
    %c0_i32_0 = arith.constant 0 : i32
    %c0_i32_1 = arith.constant 0 : i32
    return %arg0, %c0_i32, %c0_i32_0 : i32, i32, i32
  }
  func.func @transform_7(%arg0: i32) -> (i32, i32, i32) {
    %c0_i32 = arith.constant 0 : i32
    %c0_i32_0 = arith.constant 0 : i32
    %c0_i32_1 = arith.constant 0 : i32
    return %arg0, %c0_i32, %c0_i32_0 : i32, i32, i32
  }
}

module attributes {stable_mosaic.version = 11 : i64} {
  func.func @_conv2_ca_sa_kernel(%arg0: i32, %arg1: memref<1x8x240xbf16, #tpu.memory_space<vmem>>, %arg2: memref<1x8x192xbf16, #tpu.memory_space<vmem>>, %arg3: memref<8x72xbf16, #tpu.memory_space<vmem>>, %arg4: memref<8x1xf32, #tpu.memory_space<vmem>>, %arg5: memref<8x1xf32, #tpu.memory_space<vmem>>, %arg6: memref<4x8xf32, #tpu.memory_space<vmem>>, %arg7: memref<4x1xf32, #tpu.memory_space<vmem>>, %arg8: memref<8x4xf32, #tpu.memory_space<vmem>>, %arg9: memref<8x1xf32, #tpu.memory_space<vmem>>, %arg10: memref<1x1xf32, #tpu.memory_space<vmem>>, %arg11: memref<1x98xf32, #tpu.memory_space<vmem>>, %arg12: memref<1x192xf32, #tpu.memory_space<vmem>>, %arg13: memref<1x8x192xf32, #tpu.memory_space<vmem>>) attributes {dimension_semantics = [#tpu.dimension_semantics<parallel>], iteration_bounds = array<i64: 2>, scalar_prefetch = 0 : i64, scratch_operands = 0 : i64, tpu.core_type = #tpu.core_type<tc>, window_params = [{transform_indices = @transform_0, window_bounds = array<i64: 1, 8, 240>}, {transform_indices = @transform_1, window_bounds = array<i64: 1, 8, 192>}, {pipeline_mode = #tpu.pipeline_mode<synchronous>, transform_indices = @transform_2, window_bounds = array<i64: 8, 72>}, {pipeline_mode = #tpu.pipeline_mode<synchronous>, transform_indices = @transform_3, window_bounds = array<i64: 8, 1>}, {pipeline_mode = #tpu.pipeline_mode<synchronous>, transform_indices = @transform_4, window_bounds = array<i64: 8, 1>}, {pipeline_mode = #tpu.pipeline_mode<synchronous>, transform_indices = @transform_5, window_bounds = array<i64: 4, 8>}, {pipeline_mode = #tpu.pipeline_mode<synchronous>, transform_indices = @transform_6, window_bounds = array<i64: 4, 1>}, {pipeline_mode = #tpu.pipeline_mode<synchronous>, transform_indices = @transform_7, window_bounds = array<i64: 8, 4>}, {pipeline_mode = #tpu.pipeline_mode<synchronous>, transform_indices = @transform_8, window_bounds = array<i64: 8, 1>}, {pipeline_mode = #tpu.pipeline_mode<synchronous>, transform_indices = @transform_9, window_bounds = array<i64: 1, 1>}, {pipeline_mode = #tpu.pipeline_mode<synchronous>, transform_indices = @transform_10, window_bounds = array<i64: 1, 98>}, {pipeline_mode = #tpu.pipeline_mode<synchronous>, transform_indices = @transform_11, window_bounds = array<i64: 1, 192>}, {transform_indices = @transform_12, window_bounds = array<i64: 1, 8, 192>}]} {
    %c0 = arith.constant 0 : index
    %c0_0 = arith.constant 0 : index
    %c0_1 = arith.constant 0 : index
    %0 = vector.load %arg1[%c0, %c0_0, %c0_1] : memref<1x8x240xbf16, #tpu.memory_space<vmem>>, vector<1x8x240xbf16>
    %1 = vector.shape_cast %0 : vector<1x8x240xbf16> to vector<8x240xbf16>
    %2 = vector.extract_strided_slice %1 {offsets = [0, 0], sizes = [8, 192], strides = [1, 1]} : vector<8x240xbf16> to vector<8x192xbf16>
    %3 = vector.extract_strided_slice %1 {offsets = [0, 1], sizes = [8, 192], strides = [1, 1]} : vector<8x240xbf16> to vector<8x192xbf16>
    %4 = vector.extract_strided_slice %1 {offsets = [0, 2], sizes = [8, 192], strides = [1, 1]} : vector<8x240xbf16> to vector<8x192xbf16>
    %5 = vector.extract_strided_slice %1 {offsets = [0, 16], sizes = [8, 192], strides = [1, 1]} : vector<8x240xbf16> to vector<8x192xbf16>
    %6 = vector.extract_strided_slice %1 {offsets = [0, 17], sizes = [8, 192], strides = [1, 1]} : vector<8x240xbf16> to vector<8x192xbf16>
    %7 = vector.extract_strided_slice %1 {offsets = [0, 18], sizes = [8, 192], strides = [1, 1]} : vector<8x240xbf16> to vector<8x192xbf16>
    %8 = vector.extract_strided_slice %1 {offsets = [0, 32], sizes = [8, 192], strides = [1, 1]} : vector<8x240xbf16> to vector<8x192xbf16>
    %9 = vector.extract_strided_slice %1 {offsets = [0, 33], sizes = [8, 192], strides = [1, 1]} : vector<8x240xbf16> to vector<8x192xbf16>
    %10 = vector.extract_strided_slice %1 {offsets = [0, 34], sizes = [8, 192], strides = [1, 1]} : vector<8x240xbf16> to vector<8x192xbf16>
    %11 = tpu.concatenate %2, %3, %4, %5, %6, %7, %8, %9, %10 in 0 : vector<8x192xbf16>, vector<8x192xbf16>, vector<8x192xbf16>, vector<8x192xbf16>, vector<8x192xbf16>, vector<8x192xbf16>, vector<8x192xbf16>, vector<8x192xbf16>, vector<8x192xbf16> -> vector<72x192xbf16>
    %c0_2 = arith.constant 0 : index
    %c0_3 = arith.constant 0 : index
    %12 = vector.load %arg3[%c0_2, %c0_3] : memref<8x72xbf16, #tpu.memory_space<vmem>>, vector<8x72xbf16>
    %cst = arith.constant dense<0.000000e+00> : vector<8x192xf32>
    %13 = tpu.matmul %12, %11, %cst {dimension_numbers = #tpu.dot_dimension_numbers<[1], [0], [0], [1], [0, 0, 1, 1], [], []>} : vector<8x72xbf16>, vector<72x192xbf16>, vector<8x192xf32> -> vector<8x192xf32>
    %c0_4 = arith.constant 0 : index
    %c0_5 = arith.constant 0 : index
    %14 = vector.load %arg4[%c0_4, %c0_5] : memref<8x1xf32, #tpu.memory_space<vmem>>, vector<8x1xf32>
    %15 = vector.broadcast %14 : vector<8x1xf32> to vector<8x192xf32>
    %16 = arith.mulf %13, %15 : vector<8x192xf32>
    %c0_6 = arith.constant 0 : index
    %c0_7 = arith.constant 0 : index
    %17 = vector.load %arg5[%c0_6, %c0_7] : memref<8x1xf32, #tpu.memory_space<vmem>>, vector<8x1xf32>
    %18 = vector.broadcast %17 : vector<8x1xf32> to vector<8x192xf32>
    %19 = arith.addf %16, %18 : vector<8x192xf32>
    %c0_8 = arith.constant 0 : index
    %c0_9 = arith.constant 0 : index
    %20 = vector.load %arg12[%c0_8, %c0_9] : memref<1x192xf32, #tpu.memory_space<vmem>>, vector<1x192xf32>
    %21 = vector.broadcast %20 : vector<1x192xf32> to vector<8x192xf32>
    %22 = arith.mulf %19, %21 : vector<8x192xf32>
    %cst_10 = arith.constant dense<0.000000e+00> : vector<8xf32>
    %23 = vector.multi_reduction <add>, %22, %cst_10 [1] : vector<8x192xf32> to vector<8xf32>
    %24 = vector.shape_cast %23 : vector<8xf32> to vector<8x1xf32>
    %cst_11 = arith.constant 0.0069444445 : f32
    %25 = vector.broadcast %cst_11 : f32 to vector<8x1xf32>
    %26 = arith.mulf %24, %25 : vector<8x1xf32>
    %c0_12 = arith.constant 0 : index
    %c0_13 = arith.constant 0 : index
    %27 = vector.load %arg6[%c0_12, %c0_13] : memref<4x8xf32, #tpu.memory_space<vmem>>, vector<4x8xf32>
    %cst_14 = arith.constant dense<0.000000e+00> : vector<4x1xf32>
    %28 = tpu.matmul %27, %26, %cst_14 {dimension_numbers = #tpu.dot_dimension_numbers<[1], [0], [0], [1], [0, 0, 1, 1], [], []>} : vector<4x8xf32>, vector<8x1xf32>, vector<4x1xf32> -> vector<4x1xf32>
    %c0_15 = arith.constant 0 : index
    %c0_16 = arith.constant 0 : index
    %29 = vector.load %arg7[%c0_15, %c0_16] : memref<4x1xf32, #tpu.memory_space<vmem>>, vector<4x1xf32>
    %30 = arith.addf %28, %29 : vector<4x1xf32>
    %cst_17 = arith.constant 0.000000e+00 : f32
    %31 = vector.broadcast %cst_17 : f32 to vector<4x1xf32>
    %32 = arith.cmpf oge, %30, %31 : vector<4x1xf32>
    %c0_18 = arith.constant 0 : index
    %c0_19 = arith.constant 0 : index
    %33 = vector.load %arg10[%c0_18, %c0_19] : memref<1x1xf32, #tpu.memory_space<vmem>>, vector<1x1xf32>
    %34 = vector.broadcast %33 : vector<1x1xf32> to vector<4x1xf32>
    %35 = arith.mulf %34, %30 : vector<4x1xf32>
    %36 = arith.select %32, %30, %35 : vector<4x1xi1>, vector<4x1xf32>
    %c0_20 = arith.constant 0 : index
    %c0_21 = arith.constant 0 : index
    %37 = vector.load %arg8[%c0_20, %c0_21] : memref<8x4xf32, #tpu.memory_space<vmem>>, vector<8x4xf32>
    %cst_22 = arith.constant dense<0.000000e+00> : vector<8x1xf32>
    %38 = tpu.matmul %37, %36, %cst_22 {dimension_numbers = #tpu.dot_dimension_numbers<[1], [0], [0], [1], [0, 0, 1, 1], [], []>} : vector<8x4xf32>, vector<4x1xf32>, vector<8x1xf32> -> vector<8x1xf32>
    %c0_23 = arith.constant 0 : index
    %c0_24 = arith.constant 0 : index
    %39 = vector.load %arg9[%c0_23, %c0_24] : memref<8x1xf32, #tpu.memory_space<vmem>>, vector<8x1xf32>
    %40 = arith.addf %38, %39 : vector<8x1xf32>
    %41 = arith.negf %40 : vector<8x1xf32>
    %42 = math.exp %41 : vector<8x1xf32>
    %cst_25 = arith.constant 1.000000e+00 : f32
    %43 = vector.broadcast %cst_25 : f32 to vector<8x1xf32>
    %44 = arith.addf %43, %42 : vector<8x1xf32>
    %45 = arith.divf %43, %44 : vector<8x1xf32>
    %46 = vector.broadcast %45 : vector<8x1xf32> to vector<8x192xf32>
    %47 = arith.mulf %19, %46 : vector<8x192xf32>
    %48 = arith.mulf %47, %19 : vector<8x192xf32>
    %cst_26 = arith.constant dense<0.000000e+00> : vector<192xf32>
    %49 = vector.multi_reduction <add>, %48, %cst_26 [0] : vector<8x192xf32> to vector<192xf32>
    %50 = vector.shape_cast %49 : vector<192xf32> to vector<1x192xf32>
    %cst_27 = arith.constant 8.000000e+00 : f32
    %51 = vector.broadcast %cst_27 : f32 to vector<1x192xf32>
    %52 = arith.divf %50, %51 : vector<1x192xf32>
    %53 = arith.mulf %52, %20 : vector<1x192xf32>
    %cst_28 = arith.constant dense<0xFF800000> : vector<192xf32>
    %54 = vector.multi_reduction <maximumf>, %48, %cst_28 [0] : vector<8x192xf32> to vector<192xf32>
    %55 = vector.shape_cast %54 : vector<192xf32> to vector<1x192xf32>
    %56 = arith.mulf %55, %20 : vector<1x192xf32>
    %cst_29 = arith.constant 0.000000e+00 : f32
    %57 = vector.broadcast %cst_29 : f32 to vector<2x64xf32>
    %58 = tpu.concatenate %53, %56 in 0 : vector<1x192xf32>, vector<1x192xf32> -> vector<2x192xf32>
    %59 = tpu.concatenate %57, %58, %57 in 1 : vector<2x64xf32>, vector<2x192xf32>, vector<2x64xf32> -> vector<2x320xf32>
    %60 = vector.extract_strided_slice %59 {offsets = [0, 13], sizes = [2, 192], strides = [1, 1]} : vector<2x320xf32> to vector<2x192xf32>
    %61 = vector.extract_strided_slice %59 {offsets = [0, 14], sizes = [2, 192], strides = [1, 1]} : vector<2x320xf32> to vector<2x192xf32>
    %62 = vector.extract_strided_slice %59 {offsets = [0, 15], sizes = [2, 192], strides = [1, 1]} : vector<2x320xf32> to vector<2x192xf32>
    %63 = vector.extract_strided_slice %59 {offsets = [0, 16], sizes = [2, 192], strides = [1, 1]} : vector<2x320xf32> to vector<2x192xf32>
    %64 = vector.extract_strided_slice %59 {offsets = [0, 17], sizes = [2, 192], strides = [1, 1]} : vector<2x320xf32> to vector<2x192xf32>
    %65 = vector.extract_strided_slice %59 {offsets = [0, 18], sizes = [2, 192], strides = [1, 1]} : vector<2x320xf32> to vector<2x192xf32>
    %66 = vector.extract_strided_slice %59 {offsets = [0, 19], sizes = [2, 192], strides = [1, 1]} : vector<2x320xf32> to vector<2x192xf32>
    %67 = vector.extract_strided_slice %59 {offsets = [0, 29], sizes = [2, 192], strides = [1, 1]} : vector<2x320xf32> to vector<2x192xf32>
    %68 = vector.extract_strided_slice %59 {offsets = [0, 30], sizes = [2, 192], strides = [1, 1]} : vector<2x320xf32> to vector<2x192xf32>
    %69 = vector.extract_strided_slice %59 {offsets = [0, 31], sizes = [2, 192], strides = [1, 1]} : vector<2x320xf32> to vector<2x192xf32>
    %70 = vector.extract_strided_slice %59 {offsets = [0, 32], sizes = [2, 192], strides = [1, 1]} : vector<2x320xf32> to vector<2x192xf32>
    %71 = vector.extract_strided_slice %59 {offsets = [0, 33], sizes = [2, 192], strides = [1, 1]} : vector<2x320xf32> to vector<2x192xf32>
    %72 = vector.extract_strided_slice %59 {offsets = [0, 34], sizes = [2, 192], strides = [1, 1]} : vector<2x320xf32> to vector<2x192xf32>
    %73 = vector.extract_strided_slice %59 {offsets = [0, 35], sizes = [2, 192], strides = [1, 1]} : vector<2x320xf32> to vector<2x192xf32>
    %74 = vector.extract_strided_slice %59 {offsets = [0, 45], sizes = [2, 192], strides = [1, 1]} : vector<2x320xf32> to vector<2x192xf32>
    %75 = vector.extract_strided_slice %59 {offsets = [0, 46], sizes = [2, 192], strides = [1, 1]} : vector<2x320xf32> to vector<2x192xf32>
    %76 = vector.extract_strided_slice %59 {offsets = [0, 47], sizes = [2, 192], strides = [1, 1]} : vector<2x320xf32> to vector<2x192xf32>
    %77 = vector.extract_strided_slice %59 {offsets = [0, 48], sizes = [2, 192], strides = [1, 1]} : vector<2x320xf32> to vector<2x192xf32>
    %78 = vector.extract_strided_slice %59 {offsets = [0, 49], sizes = [2, 192], strides = [1, 1]} : vector<2x320xf32> to vector<2x192xf32>
    %79 = vector.extract_strided_slice %59 {offsets = [0, 50], sizes = [2, 192], strides = [1, 1]} : vector<2x320xf32> to vector<2x192xf32>
    %80 = vector.extract_strided_slice %59 {offsets = [0, 51], sizes = [2, 192], strides = [1, 1]} : vector<2x320xf32> to vector<2x192xf32>
    %81 = vector.extract_strided_slice %59 {offsets = [0, 61], sizes = [2, 192], strides = [1, 1]} : vector<2x320xf32> to vector<2x192xf32>
    %82 = vector.extract_strided_slice %59 {offsets = [0, 62], sizes = [2, 192], strides = [1, 1]} : vector<2x320xf32> to vector<2x192xf32>
    %83 = vector.extract_strided_slice %59 {offsets = [0, 63], sizes = [2, 192], strides = [1, 1]} : vector<2x320xf32> to vector<2x192xf32>
    %84 = vector.extract_strided_slice %59 {offsets = [0, 64], sizes = [2, 192], strides = [1, 1]} : vector<2x320xf32> to vector<2x192xf32>
    %85 = vector.extract_strided_slice %59 {offsets = [0, 65], sizes = [2, 192], strides = [1, 1]} : vector<2x320xf32> to vector<2x192xf32>
    %86 = vector.extract_strided_slice %59 {offsets = [0, 66], sizes = [2, 192], strides = [1, 1]} : vector<2x320xf32> to vector<2x192xf32>
    %87 = vector.extract_strided_slice %59 {offsets = [0, 67], sizes = [2, 192], strides = [1, 1]} : vector<2x320xf32> to vector<2x192xf32>
    %88 = vector.extract_strided_slice %59 {offsets = [0, 77], sizes = [2, 192], strides = [1, 1]} : vector<2x320xf32> to vector<2x192xf32>
    %89 = vector.extract_strided_slice %59 {offsets = [0, 78], sizes = [2, 192], strides = [1, 1]} : vector<2x320xf32> to vector<2x192xf32>
    %90 = vector.extract_strided_slice %59 {offsets = [0, 79], sizes = [2, 192], strides = [1, 1]} : vector<2x320xf32> to vector<2x192xf32>
    %91 = vector.extract_strided_slice %59 {offsets = [0, 80], sizes = [2, 192], strides = [1, 1]} : vector<2x320xf32> to vector<2x192xf32>
    %92 = vector.extract_strided_slice %59 {offsets = [0, 81], sizes = [2, 192], strides = [1, 1]} : vector<2x320xf32> to vector<2x192xf32>
    %93 = vector.extract_strided_slice %59 {offsets = [0, 82], sizes = [2, 192], strides = [1, 1]} : vector<2x320xf32> to vector<2x192xf32>
    %94 = vector.extract_strided_slice %59 {offsets = [0, 83], sizes = [2, 192], strides = [1, 1]} : vector<2x320xf32> to vector<2x192xf32>
    %95 = vector.extract_strided_slice %59 {offsets = [0, 93], sizes = [2, 192], strides = [1, 1]} : vector<2x320xf32> to vector<2x192xf32>
    %96 = vector.extract_strided_slice %59 {offsets = [0, 94], sizes = [2, 192], strides = [1, 1]} : vector<2x320xf32> to vector<2x192xf32>
    %97 = vector.extract_strided_slice %59 {offsets = [0, 95], sizes = [2, 192], strides = [1, 1]} : vector<2x320xf32> to vector<2x192xf32>
    %98 = vector.extract_strided_slice %59 {offsets = [0, 96], sizes = [2, 192], strides = [1, 1]} : vector<2x320xf32> to vector<2x192xf32>
    %99 = vector.extract_strided_slice %59 {offsets = [0, 97], sizes = [2, 192], strides = [1, 1]} : vector<2x320xf32> to vector<2x192xf32>
    %100 = vector.extract_strided_slice %59 {offsets = [0, 98], sizes = [2, 192], strides = [1, 1]} : vector<2x320xf32> to vector<2x192xf32>
    %101 = vector.extract_strided_slice %59 {offsets = [0, 99], sizes = [2, 192], strides = [1, 1]} : vector<2x320xf32> to vector<2x192xf32>
    %102 = vector.extract_strided_slice %59 {offsets = [0, 109], sizes = [2, 192], strides = [1, 1]} : vector<2x320xf32> to vector<2x192xf32>
    %103 = vector.extract_strided_slice %59 {offsets = [0, 110], sizes = [2, 192], strides = [1, 1]} : vector<2x320xf32> to vector<2x192xf32>
    %104 = vector.extract_strided_slice %59 {offsets = [0, 111], sizes = [2, 192], strides = [1, 1]} : vector<2x320xf32> to vector<2x192xf32>
    %105 = vector.extract_strided_slice %59 {offsets = [0, 112], sizes = [2, 192], strides = [1, 1]} : vector<2x320xf32> to vector<2x192xf32>
    %106 = vector.extract_strided_slice %59 {offsets = [0, 113], sizes = [2, 192], strides = [1, 1]} : vector<2x320xf32> to vector<2x192xf32>
    %107 = vector.extract_strided_slice %59 {offsets = [0, 114], sizes = [2, 192], strides = [1, 1]} : vector<2x320xf32> to vector<2x192xf32>
    %108 = vector.extract_strided_slice %59 {offsets = [0, 115], sizes = [2, 192], strides = [1, 1]} : vector<2x320xf32> to vector<2x192xf32>
    %109 = tpu.concatenate %60, %61, %62, %63, %64, %65, %66, %67, %68, %69, %70, %71, %72, %73, %74, %75 in 0 : vector<2x192xf32>, vector<2x192xf32>, vector<2x192xf32>, vector<2x192xf32>, vector<2x192xf32>, vector<2x192xf32>, vector<2x192xf32>, vector<2x192xf32>, vector<2x192xf32>, vector<2x192xf32>, vector<2x192xf32>, vector<2x192xf32>, vector<2x192xf32>, vector<2x192xf32>, vector<2x192xf32>, vector<2x192xf32> -> vector<32x192xf32>
    %110 = tpu.concatenate %76, %77, %78, %79, %80, %81, %82, %83, %84, %85, %86, %87, %88, %89, %90, %91 in 0 : vector<2x192xf32>, vector<2x192xf32>, vector<2x192xf32>, vector<2x192xf32>, vector<2x192xf32>, vector<2x192xf32>, vector<2x192xf32>, vector<2x192xf32>, vector<2x192xf32>, vector<2x192xf32>, vector<2x192xf32>, vector<2x192xf32>, vector<2x192xf32>, vector<2x192xf32>, vector<2x192xf32>, vector<2x192xf32> -> vector<32x192xf32>
    %111 = tpu.concatenate %92, %93, %94, %95, %96, %97, %98, %99, %100, %101, %102, %103, %104, %105, %106, %107 in 0 : vector<2x192xf32>, vector<2x192xf32>, vector<2x192xf32>, vector<2x192xf32>, vector<2x192xf32>, vector<2x192xf32>, vector<2x192xf32>, vector<2x192xf32>, vector<2x192xf32>, vector<2x192xf32>, vector<2x192xf32>, vector<2x192xf32>, vector<2x192xf32>, vector<2x192xf32>, vector<2x192xf32>, vector<2x192xf32> -> vector<32x192xf32>
    %112 = tpu.concatenate %109, %110, %111, %108 in 0 : vector<32x192xf32>, vector<32x192xf32>, vector<32x192xf32>, vector<2x192xf32> -> vector<98x192xf32>
    %c0_30 = arith.constant 0 : index
    %c0_31 = arith.constant 0 : index
    %113 = vector.load %arg11[%c0_30, %c0_31] : memref<1x98xf32, #tpu.memory_space<vmem>>, vector<1x98xf32>
    %cst_32 = arith.constant dense<0.000000e+00> : vector<1x192xf32>
    %114 = tpu.matmul %113, %112, %cst_32 {dimension_numbers = #tpu.dot_dimension_numbers<[1], [0], [0], [1], [0, 0, 1, 1], [], []>} : vector<1x98xf32>, vector<98x192xf32>, vector<1x192xf32> -> vector<1x192xf32>
    %115 = arith.negf %114 : vector<1x192xf32>
    %116 = math.exp %115 : vector<1x192xf32>
    %cst_33 = arith.constant 1.000000e+00 : f32
    %117 = vector.broadcast %cst_33 : f32 to vector<1x192xf32>
    %118 = arith.addf %117, %116 : vector<1x192xf32>
    %119 = arith.divf %117, %118 : vector<1x192xf32>
    %120 = vector.broadcast %119 : vector<1x192xf32> to vector<8x192xf32>
    %121 = arith.mulf %48, %120 : vector<8x192xf32>
    %c0_34 = arith.constant 0 : index
    %c0_35 = arith.constant 0 : index
    %c0_36 = arith.constant 0 : index
    %122 = vector.load %arg2[%c0_34, %c0_35, %c0_36] : memref<1x8x192xbf16, #tpu.memory_space<vmem>>, vector<1x8x192xbf16>
    %123 = vector.shape_cast %122 : vector<1x8x192xbf16> to vector<8x192xbf16>
    %124 = arith.extf %123 : vector<8x192xbf16> to vector<8x192xf32>
    %125 = arith.addf %121, %124 : vector<8x192xf32>
    %cst_37 = arith.constant 0.000000e+00 : f32
    %126 = vector.broadcast %cst_37 : f32 to vector<8x192xf32>
    %127 = arith.maximumf %125, %126 : vector<8x192xf32>
    %c0_38 = arith.constant 0 : index
    %c0_39 = arith.constant 0 : index
    %c0_40 = arith.constant 0 : index
    %128 = vector.load %arg13[%c0_38, %c0_39, %c0_40] : memref<1x8x192xf32, #tpu.memory_space<vmem>>, vector<1x8x192xf32>
    %129 = vector.shape_cast %128 : vector<1x8x192xf32> to vector<8x192xf32>
    %130 = vector.shape_cast %127 : vector<8x192xf32> to vector<1x8x192xf32>
    tpu.vector_store %arg13[%c0_38, %c0_39, %c0_40], %130 {strides = array<i32>} : memref<1x8x192xf32, #tpu.memory_space<vmem>>, vector<1x8x192xf32>,
    return
  }
  func.func @transform_0(%arg0: i32) -> (i32, i32, i32) {
    %c0_i32 = arith.constant 0 : i32
    %c0_i32_0 = arith.constant 0 : i32
    %c0_i32_1 = arith.constant 0 : i32
    return %arg0, %c0_i32, %c0_i32_0 : i32, i32, i32
  }
  func.func @transform_1(%arg0: i32) -> (i32, i32, i32) {
    %c0_i32 = arith.constant 0 : i32
    %c0_i32_0 = arith.constant 0 : i32
    %c0_i32_1 = arith.constant 0 : i32
    return %arg0, %c0_i32, %c0_i32_0 : i32, i32, i32
  }
  func.func @transform_2(%arg0: i32) -> (i32, i32) {
    %c0_i32 = arith.constant 0 : i32
    %c0_i32_0 = arith.constant 0 : i32
    %c0_i32_1 = arith.constant 0 : i32
    return %c0_i32, %c0_i32_0 : i32, i32
  }
  func.func @transform_3(%arg0: i32) -> (i32, i32) {
    %c0_i32 = arith.constant 0 : i32
    %c0_i32_0 = arith.constant 0 : i32
    %c0_i32_1 = arith.constant 0 : i32
    return %c0_i32, %c0_i32_0 : i32, i32
  }
  func.func @transform_4(%arg0: i32) -> (i32, i32) {
    %c0_i32 = arith.constant 0 : i32
    %c0_i32_0 = arith.constant 0 : i32
    %c0_i32_1 = arith.constant 0 : i32
    return %c0_i32, %c0_i32_0 : i32, i32
  }
  func.func @transform_5(%arg0: i32) -> (i32, i32) {
    %c0_i32 = arith.constant 0 : i32
    %c0_i32_0 = arith.constant 0 : i32
    %c0_i32_1 = arith.constant 0 : i32
    return %c0_i32, %c0_i32_0 : i32, i32
  }
  func.func @transform_6(%arg0: i32) -> (i32, i32) {
    %c0_i32 = arith.constant 0 : i32
    %c0_i32_0 = arith.constant 0 : i32
    %c0_i32_1 = arith.constant 0 : i32
    return %c0_i32, %c0_i32_0 : i32, i32
  }
  func.func @transform_7(%arg0: i32) -> (i32, i32) {
    %c0_i32 = arith.constant 0 : i32
    %c0_i32_0 = arith.constant 0 : i32
    %c0_i32_1 = arith.constant 0 : i32
    return %c0_i32, %c0_i32_0 : i32, i32
  }
  func.func @transform_8(%arg0: i32) -> (i32, i32) {
    %c0_i32 = arith.constant 0 : i32
    %c0_i32_0 = arith.constant 0 : i32
    %c0_i32_1 = arith.constant 0 : i32
    return %c0_i32, %c0_i32_0 : i32, i32
  }
  func.func @transform_9(%arg0: i32) -> (i32, i32) {
    %c0_i32 = arith.constant 0 : i32
    %c0_i32_0 = arith.constant 0 : i32
    %c0_i32_1 = arith.constant 0 : i32
    return %c0_i32, %c0_i32_0 : i32, i32
  }
  func.func @transform_10(%arg0: i32) -> (i32, i32) {
    %c0_i32 = arith.constant 0 : i32
    %c0_i32_0 = arith.constant 0 : i32
    %c0_i32_1 = arith.constant 0 : i32
    return %c0_i32, %c0_i32_0 : i32, i32
  }
  func.func @transform_11(%arg0: i32) -> (i32, i32) {
    %c0_i32 = arith.constant 0 : i32
    %c0_i32_0 = arith.constant 0 : i32
    %c0_i32_1 = arith.constant 0 : i32
    return %c0_i32, %c0_i32_0 : i32, i32
  }
  func.func @transform_12(%arg0: i32) -> (i32, i32, i32) {
    %c0_i32 = arith.constant 0 : i32
    %c0_i32_0 = arith.constant 0 : i32
    %c0_i32_1 = arith.constant 0 : i32
    return %arg0, %c0_i32, %c0_i32_0 : i32, i32, i32
  }
}

</mosaic_0001>

<bundles_post_ra>
// kernel: cba_block_forward.2
= control target key start
LH: loop header
LB: loop body
LE: loop exit
PB: predicated region body
PF: predicated region fallthrough
CT: control target
= control target key end

     0   :  { %s935_s24 = smov 0   ;;  %s1179_s0 = inlined_call_operand.vmem [shape: bf16[2,4,288], index: 0, kind: input, shape index: {}]   ;;  %s1180_s1 = inlined_call_operand.vmem [shape: bf16[8,36], index: 1, kind: input, shape index: {}]   ;;  %s1181_s2 = inlined_call_operand.vmem [shape: f32[8,1], index: 2, kind: input, shape index: {}]   ;;  %s1182_s3 = inlined_call_operand.vmem [shape: f32[8,1], index: 3, kind: input, shape index: {}]   ;;  %s1183_s4 = inlined_call_operand.vmem [shape: bf16[8,100], index: 4, kind: input, shape index: {}]   ;;  %s1184_s5 = inlined_call_operand.vmem [shape: f32[8,1], index: 5, kind: input, shape index: {}]   ;;  %s1185_s6 = inlined_call_operand.vmem [shape: bf16[2,8,240], index: 6, kind: output, shape index: {0}]   ;;  %s1186_s7 = inlined_call_operand.vmem [shape: bf16[2,8,192], index: 7, kind: output, shape index: {1}]  }
   0x1 LB: > { %s814_s25 = sadd.s32 4294967295, %s874_s24   ;;  %p818_p0 = scmp.ge.s32.totalorder %s874_s24, 1  ;;  %s874_s24 = sphi %s935_s24, %s18_s24  }
   0x2   : > { %p240_p1 = scmp.lt.s32.totalorder %s874_s24, 3 }
   0x4   : > { %p241_p2 = pnand %p818_p0, %p240_p1 }
   0x5   : > { %p277_p3 = scmp.lt.s32.totalorder (!%p241_p2), %s814_s25, 1  ;;  %s877_s30 = smov (!%p241_p2), 113  }
   0x6   : > { %244 = sbr.rel (%p241_p2) target bundleno = 516 (0x204), region = 44  ;;  %s878_s8 = smov (!%p241_p2), 109  }
   0x7   : > { %s879_s9 = smov (!%p241_p2), 112   ;;  %s880_s10 = smov (!%p241_p2), 111  }
   0x8   : > { %s881_s11 = smov (!%p241_p2), 110   ;;  %s882_s12 = smov (!%p241_p2), 127  }
   0x9   : > { %s883_s13 = smov (!%p241_p2), 126   ;;  %s884_s14 = smov (!%p241_p2), 125  }
   0xa   : > { %s885_s15 = smov (!%p241_p2), 94   ;;  %s886_s16 = smov (!%p241_p2), 93  }
   0xb   : > { %v298_v0 = vlaneseq  ;;  %v876_v1 = vmov 1983009808   ;;  %s1188_s25 = smov (!%p277_p3, %s814_s25), 1  ;;  %s887_s17 = smov 92   ;;  %vm527_vm0 = vcmask 891904   ;;  %vm330_vm1 = vcmask 916480  }
   0xc   : > { %v296_v2 = vunpack.c.l.s4 %v876_v1  ;;  %s836_s26 = smul.u32 6, %s1188_s25  ;;  %s888_s18 = smov 80   ;;  %vm346_vm2 = vcmask 908288   ;;  %vm608_vm3 = vcmask 924672   ;;  %vm386_vm4 = vcmask 1041408  }
   0xd   : > { %v299_v3 = vshrl.u32 %v298_v0, 7  ;;  %s889_s19 = smov 96   ;;  %s890_s20 = smov 108   ;;  %vm355_vm5 = vcmask 900096   ;;  %vm393_vm6 = vcmask 1043456   ;;  %vm398_vm7 = vcmask 1045504  }
   0xe   : > { %v297_v4 = vunpack.c.0.s8 %v296_v2  ;;  %s281_s29 = scalar_lea.vmem %s1179_s0, %s836_s26  ;;  %s891_s21 = smov 79   ;;  %vm316_vm8 = vcmask 1039360   ;;  %vm323_vm9 = vcmask 1031168   ;;  %vm506_vm10 = vcmask 1022976  }
   0xf   : > { %v293_v6 = vld [vmem:[%s281_s29] sm:$0x3f]  ;;  %vm383_vm11 = vcmask 769024   ;;  %vm539_vm12 = vcmask 760832   ;;  %s892_s22 = smov 95   ;;  %vm545_vm13 = vcmask 752640  }
  0x10   : > { %v300_v5 = vsub.s32 %v297_v4, %v299_v3  ;;  %v332_v9 = vcombine.high %v293_v6, %v293_v6  ;;  %v303_v10 = vcombine.low %v293_v6, %v293_v6  ;;  %s894_s23 = smov 124   ;;  %vm649_vm14 = vcmask 646144  }
  0x11   : > { %vm551_vm15 = vcmask 654336  }
  0x12   : > { %v949_v7 = vrot.slane %v293_v6, %v300_v5  ;;  %v339_v11 = vrot.slane %v332_v9, %v300_v5  ;;  %v960_v12 = vrot.slane %v303_v10, %v300_v5  ;;  %v893_v6 = vmov 0  }
  0x13   : > { %464 = vmatprep.mubr.bf16.mxu0 %v893_v6  ;;  %706 = vmatprep.mubr.bf16.mxu1 %v893_v6 }
  0x14   : > { %604 = vrot.lane.b32.xlu1 %v949_v7, %s877_s30  ;;  %523 = vrot.lane.b32.xlu0 %v949_v7, %s878_s8  ;;  %v955_v8 = vcombine.high %v949_v7, %v949_v7  ;;  %v311_v13 = vcombine.high %v960_v12, %v960_v12  ;;  %v970_v14 = vcombine.low %v949_v7, %v949_v7 }
  0x15   : > { %v358_v15 = vcombine.low %v339_v11, %v339_v11  ;;  %v981_v16 = vcombine.low %v960_v12, %v960_v12  ;;  %865 = vset.pattern.permute.xlu1 %v893_v6  ;;  %864 = vset.pattern.permute.xlu0 %v893_v6 }
  0x18   : > { %610 = vrot.lane.b32.xlu1 %v949_v7, %s879_s9  ;;  %525 = vrot.lane.b32.xlu0 %v955_v8, %s878_s8 }
  0x1c   : > { %619 = vrot.lane.b32.xlu1 %v339_v11, %s878_s8  ;;  %606 = vrot.lane.b32.xlu0 %v955_v8, %s877_s30 }
  0x20   : > { %328 = vrot.lane.b32.xlu1 %v960_v12, %s879_s9  ;;  %514 = vrot.lane.b32.xlu0 %v311_v13, %s879_s9 }
  0x24   : > { %517 = vrot.lane.b32.xlu1 %v970_v14, %s880_s10  ;;  %340 = vrot.lane.b32.xlu0 %v949_v7, %s880_s10 }
  0x28   : > { %349 = vrot.lane.b32.xlu1 %v960_v12, %s881_s11  ;;  %613 = vrot.lane.b32.xlu0 %v358_v15, %s880_s10 }
  0x2c   : > { %616 = vrot.lane.b32.xlu1 %v970_v14, %s881_s11  ;;  %520 = vrot.lane.b32.xlu0 %v981_v16, %s881_s11 }
  0x30   : > { %314 = vrot.lane.b32.xlu1 %v311_v13, %s882_s12  ;;  %312 = vrot.lane.b32.xlu0 %v960_v12, %s882_s12 }
  0x34   : > { %321 = vrot.lane.b32.xlu1 %v949_v7, %s883_s13  ;;  %319 = vrot.lane.b32.xlu0 %v970_v14, %s883_s13  ;;  %s832_s13 = sshll.u32 %s1188_s25, 3 }
  0x35   : > { %s286_s25 = scalar_lea.vmem %s1185_s6, %s832_s13 }
  0x38   : > { %504 = vrot.lane.b32.xlu1 %v960_v12, %s884_s14  ;;  %502 = vrot.lane.b32.xlu0 %v981_v16, %s884_s14 }
  0x3c   : > { %379 = vrot.lane.b32.xlu1 %v955_v8, %s885_s15  ;;  %377 = vrot.lane.b32.xlu0 %v949_v7, %s885_s15 }
  0x40   : > { %537 = vrot.lane.b32.xlu1 %v311_v13, %s886_s16  ;;  %535 = vrot.lane.b32.xlu0 %v960_v12, %s886_s16  ;;  %s291_s16 = scalar_lea.vmem %s1186_s7, %s832_s13 }
  0x44   : > { %543 = vrot.lane.b32.xlu1 %v949_v7, %s887_s17  ;;  %541 = vrot.lane.b32.xlu0 %v970_v14, %s887_s17 }
  0x48   : > { %547 = vrot.lane.b32.xlu1 %v981_v16, %s888_s18  ;;  %381 = vrot.lane.b32.xlu0 %v339_v11, %s885_s15 }
  0x4c   : > { %342 = vrot.lane.b32.xlu1 %v955_v8, %s880_s10  ;;  %549 = vrot.lane.b32.xlu0 %v960_v12, %s888_s18 }
  0x50   : > { %351 = vrot.lane.b32.xlu1 %v311_v13, %s881_s11  ;;  %344 = vrot.lane.b32.xlu0 %v339_v11, %s880_s10 }
  0x54   : > { %353 = vrot.lane.b32.xlu0 %v949_v7, %s881_s11  ;;  %361 = vrot.lane.b32.xlu1 %v949_v7, %s889_s19 }
  0x58   : > { %363 = vrot.lane.b32.xlu0 %v358_v15, %s889_s19  ;;  %529 = vrot.lane.b32.xlu1 %v960_v12, %s890_s20 }
  0x5c   : > { %531 = vrot.lane.b32.xlu0 %v311_v13, %s890_s20 }
  0x86   : > { %v605_v17 = vpop.permute.xlu1 %604  ;;  %v524_v18 = vpop.permute.xlu0 %523 }
  0x8a   : > { %v611_v19 = vpop.permute.xlu1 %610  ;;  %v1009_v20 = vpop.permute.xlu0 %525 }
  0x8b   : > { %v1012_v21 = vsel %vm527_vm0, %v524_v18, %v1009_v20 }
  0x8c   : > { %645 = vrot.lane.b32.xlu0 %v1012_v21, %s891_s21 }
  0x8e   : > { %v620_v22 = vpop.permute.xlu1 %619  ;;  %v607_v23 = vpop.permute.xlu0 %606 }
  0x8f   : > { %v621_v24 = vsel %vm527_vm0, %v1009_v20, %v620_v22  ;;  %v609_v33 = vsel %vm608_vm3, %v605_v17, %v607_v23  ;;  %v473_v17 = vld [vmem:[%s1181_s2] sm:$0xff]  ;;  %vm365_vm0 = vcmask 785408   ;;  %vm374_vm3 = vcmask 777216  }
  0x90   : > { %647 = vrot.lane.b32.xlu1 %v621_v24, %s891_s21 }
  0x92   : > { %v1018_v25 = vpop.permute.xlu1 %328  ;;  %v1020_v26 = vpop.permute.xlu0 %514 }
  0x93   : > { %v1029_v31 = vsel %vm330_vm1, %v1018_v25, %v1020_v26  ;;  %v612_v47 = vsel %vm330_vm1, %v1020_v26, %v611_v19 }
  0x94   : > { %v623_v34 = vsel %vm386_vm4, %v609_v33, %v1029_v31  ;;  %v626_v58 = vsel %vm386_vm4, %v607_v23, %v612_v47 }
  0x96   : > { %v518_v27 = vpop.permute.xlu1 %517  ;;  %v1022_v28 = vpop.permute.xlu0 %340 }
  0x97   : > { %v1033_v32 = vsel %vm346_vm2, %v518_v27, %v1022_v28 }
  0x98   : > { %v627_v38 = vsel %vm393_vm6, %v623_v34, %v1033_v32 }
  0x9a   : > { %v1024_v29 = vpop.permute.xlu1 %349  ;;  %v614_v30 = vpop.permute.xlu0 %613 }
  0x9b   : > { %v615_v52 = vsel %vm346_vm2, %v1022_v28, %v614_v30 }
  0x9c   : > { %v629_v61 = vsel %vm393_vm6, %v626_v58, %v615_v52 }
  0x9e   : > { %v617_v35 = vpop.permute.xlu1 %616  ;;  %v521_v36 = vpop.permute.xlu0 %520 }
  0x9f   : > { %v1039_v37 = vsel %vm355_vm5, %v521_v36, %v1024_v29  ;;  %v618_v56 = vsel %vm355_vm5, %v1024_v29, %v617_v35 }
  0xa0   : > { %v630_v39 = vsel %vm398_vm7, %v627_v38, %v1039_v37  ;;  %v632_v62 = vsel %vm398_vm7, %v629_v61, %v618_v56 }
  0xa1   : > { %641 = vrot.lane.b32.xlu0 %v630_v39, %s891_s21 }
  0xa2   : > { %v315_v40 = vpop.permute.xlu1 %314  ;;  %v313_v41 = vpop.permute.xlu0 %312 }
  0xa3   : > { %v317_v44 = vsel %vm316_vm8, %v313_v41, %v315_v40  ;;  %v392_v46 = vsel %vm386_vm4, %v955_v8, %v315_v40  ;;  %vm499_vm8 = vcmask 916484  }
  0xa4   : > { %v389_v48 = vsel %vm386_vm4, %v949_v7, %v317_v44 }
  0xa6   : > { %v322_v42 = vpop.permute.xlu1 %321  ;;  %v320_v43 = vpop.permute.xlu0 %319 }
  0xa7   : > { %v324_v45 = vsel %vm323_vm9, %v320_v43, %v322_v42  ;;  %v1053_v49 = vsel %vm393_vm6, %v392_v46, %v322_v42 }
  0xa8   : > { %v1062_v55 = vsel %vm393_vm6, %v389_v48, %v324_v45 }
  0xaa   : > { %v505_v50 = vpop.permute.xlu1 %504  ;;  %v503_v51 = vpop.permute.xlu0 %502 }
  0xab   : > { %v507_v53 = vsel %vm506_vm10, %v503_v51, %v505_v50  ;;  %v1059_v54 = vsel %vm398_vm7, %v1053_v49, %v505_v50  ;;  %vm500_vm10 = vmor %vm499_vm8, %vm393_vm6 }
  0xac   : > { %639 = vrot.lane.b32.xlu1 %v1059_v54, %s891_s21  ;;  %v1070_v57 = vsel %vm398_vm7, %v1062_v55, %v507_v53 }
  0xad   : > { %637 = vrot.lane.b32.xlu0 %v1070_v57, %s891_s21 }
  0xae   : > { %v1075_v59 = vpop.permute.xlu1 %379  ;;  %v378_v60 = vpop.permute.xlu0 %377 }
  0xaf   : > { %v384_v63 = vsel %vm383_vm11, %v378_v60, %v1075_v59 }
  0xb0   : > { %643 = vrot.lane.b32.xlu1 %v632_v62, %s891_s21  ;;  %v427_v13 = vsel %vm386_vm4, %v384_v63, 0 }
  0xb1   : > { %370 = vrot.lane.b32.xlu0 %v960_v12, %s892_s22 }
  0xb2   : > { %v538_v0 = vpop.permute.xlu1 %537  ;;  %v536_v1 = vpop.permute.xlu0 %535 }
  0xb3   : > { %v540_v2 = vsel %vm539_vm12, %v536_v1, %v538_v0  ;;  %v593_v47 = vsel %vm386_vm4, %v1075_v59, %v538_v0 }
  0xb4   : > { %359 = vrot.lane.b32.xlu1 %v970_v14, %s889_s19  ;;  %v590_v3 = vsel %vm386_vm4, %v384_v63, %v540_v2 }
  0xb5   : > { %368 = vrot.lane.b32.xlu0 %v981_v16, %s892_s22 }
  0xb6   : > { %v544_v4 = vpop.permute.xlu1 %543  ;;  %v542_v5 = vpop.permute.xlu0 %541 }
  0xb7   : > { %v546_v9 = vsel %vm545_vm13, %v542_v5, %v544_v4  ;;  %v597_v52 = vsel %vm393_vm6, %v593_v47, %v544_v4 }
  0xb8   : > { %372 = vrot.lane.b32.xlu1 %v970_v14, %s892_s22  ;;  %v1089_v10 = vsel %vm393_vm6, %v590_v3, %v546_v9 }
  0xb9   : > { %510 = vrot.lane.b32.xlu0 %v955_v8, %s894_s23  ;;  %v481_v8 = vld [vmem:[%s1182_s3] sm:$0xff] }
  0xba   : > { %v548_v11 = vpop.permute.xlu1 %547  ;;  %v382_v12 = vpop.permute.xlu0 %381 }
  0xbb   : > { %v385_v15 = vsel %vm383_vm11, %v1075_v59, %v382_v12 }
  0xbc   : > { %508 = vrot.lane.b32.xlu1 %v949_v7, %s894_s23  ;;  %824 = vmatprep.subr.msk.bf16.mxu0 %vm386_vm4, %v385_v15 }
  0xbd   : > { %443 = vmatpush1.bf16.msra.mxu0 %v427_v13  ;;  %476 = vperm.xlu0 %864, %v473_v17  }
  0xbe   : > { %v343_v14 = vpop.permute.xlu1 %342  ;;  %v550_v18 = vpop.permute.xlu0 %549 }
  0xbf   : > { %v347_v23 = vsel %vm346_vm2, %v1022_v28, %v343_v14  ;;  %v552_v56 = vsel %vm551_vm15, %v548_v11, %v550_v18  ;;  %v602_v0 = vsel %vm398_vm7, %v597_v52, %v550_v18 }
  0xc0   : > { %326 = vrot.lane.b32.xlu1 %v981_v16, %s879_s9  ;;  %v658_v16 = vld [vmem:[%s1184_s5] sm:$0xff]  ;;  %v599_v3 = vsel %vm398_vm7, %v1089_v10, %v552_v56 }
  0xc2   : > { %v352_v19 = vpop.permute.xlu1 %351  ;;  %v345_v22 = vpop.permute.xlu0 %344 }
  0xc3   : > { %v356_v7 = vsel %vm355_vm5, %v1024_v29, %v352_v19  ;;  %v348_v27 = vsel %vm346_vm2, %v343_v14, %v345_v22  ;;  %vm533_vm2 = vcmask 883712  }
  0xc4   : > { %v407_v24 = vsel %vm386_vm4, %v347_v23, %v356_v7  ;;  %484 = vperm.xlu1 %865, %v481_v8  }
  0xc6   : > { %v354_v30 = vpop.permute.xlu0 %353  ;;  %v362_v35 = vpop.permute.xlu1 %361 }
  0xc7   : > { %v357_v33 = vsel %vm355_vm5, %v352_v19, %v354_v30  ;;  %vm512_vm5 = vcmask 1014784  }
  0xc8   : > { %v410_v34 = vsel %vm386_vm4, %v348_v27, %v357_v33  ;;  %661 = vperm.xlu1 %865, %v658_v16  }
  0xca   : > { %v364_v36 = vpop.permute.xlu0 %363  ;;  %v530_v38 = vpop.permute.xlu1 %529 }
  0xcb   : > { %v367_v59 = vsel %vm365_vm0, %v362_v35, %v364_v36 }
  0xcc   : > { %v414_v11 = vsel %vm393_vm6, %v410_v34, %v367_v59 }
  0xce   : > { %v532_v39 = vpop.permute.xlu0 %531 }
  0xcf   : > { %v534_v62 = vsel %vm533_vm2, %v530_v38, %v532_v39  ;;  %v580_v63 = vsel %vm386_vm4, %v1009_v20, %v532_v39 }
  0xd0   : > { %v577_v5 = vsel %vm386_vm4, %v1012_v21, %v534_v62  ;;  %v583_v20 = vsel %vm393_vm6, %v580_v63, %v362_v35 }
  0xfe   : > { %v646_v40 = vpop.permute.xlu0 %645 }
 0x102   : > { %v648_v41 = vpop.permute.xlu1 %647 }
 0x103   : > { %827 = vmatprep.subr.msk.bf16.mxu1 %vm386_vm4, %v648_v41  ;;  %v652_v42 = vsel %vm649_vm14, %v646_v40, %v648_v41 }
 0x104   : > { %v669_v43 = vsel %vm386_vm4, %v652_v42, 0 }
 0x105   : > { %677 = vmatpush1.bf16.msra.mxu1 %v669_v43 }
 0x113   : > { %v642_v44 = vpop.permute.xlu0 %641 }
 0x11e   : > { %v640_v45 = vpop.permute.xlu1 %639 }
 0x11f   : > { %v638_v46 = vpop.permute.xlu0 %637 }
 0x120   : > { %v650_v61 = vsel %vm649_vm14, %v638_v46, %v640_v45 }
 0x122   : > { %v644_v48 = vpop.permute.xlu1 %643 }
 0x123   : > { %v371_v50 = vpop.permute.xlu0 %370  ;;  %678 = vmatprep.subr.bf16.mxu1 %v644_v48  ;;  %v651_v51 = vsel %vm649_vm14, %v642_v44, %v644_v48 }
 0x124   : > { %679 = vmatpush1.bf16.msra.mxu1 %v651_v51  ;;  %v587_v10 = vsel %vm398_vm7, %v583_v20, %v371_v50 }
 0x125   : > { %680 = vmatprep.subr.bf16.mxu1 %v640_v45 }
 0x126   : > { %v360_v53 = vpop.permute.xlu1 %359 }
 0x127   : > { %v366_v58 = vsel %vm365_vm0, %v360_v53, %v362_v35  ;;  %v369_v60 = vpop.permute.xlu0 %368 }
 0x128   : > { %681 = vmatpush1.bf16.msra.mxu1 %v650_v61  ;;  %v375_v1 = vsel %vm374_vm3, %v369_v60, %v371_v50  ;;  %v412_v4 = vsel %vm393_vm6, %v407_v24, %v366_v58  ;;  %v581_v15 = vsel %vm393_vm6, %v577_v5, %v366_v58 }
 0x129   : > { %682 = vmatprep.subr.bf16.mxu1 %v602_v0  ;;  %v416_v21 = vsel %vm398_vm7, %v412_v4, %v375_v1  ;;  %v584_v8 = vsel %vm398_vm7, %v581_v15, %v375_v1 }
 0x12a   : > { %v373_v2 = vpop.permute.xlu1 %372 }
 0x12b   : > { %v376_v6 = vsel %vm374_vm3, %v371_v50, %v373_v2  ;;  %v511_v9 = vpop.permute.xlu0 %510 }
 0x12c   : > { %v564_v12 = vsel %vm386_vm4, %v511_v9, %v1020_v26  ;;  %683 = vmatpush1.bf16.msra.mxu1 %v599_v3  ;;  %v419_v13 = vsel %vm398_vm7, %v414_v11, %v376_v6  ;;  %v403_v26 = vsel %vm398_vm7, %v1053_v49, %v1018_v25 }
 0x12d   : > { %444 = vmatprep.subr.bf16.mxu0 %v419_v13  ;;  %684 = vmatprep.subr.bf16.mxu1 %v587_v10  ;;  %v568_v17 = vsel %vm393_vm6, %v564_v12, %v1022_v28 }
 0x12e   : > { %445 = vmatpush1.bf16.msra.mxu0 %v416_v21  ;;  %v509_v14 = vpop.permute.xlu1 %508  ;;  %v573_v22 = vsel %vm398_vm7, %v568_v17, %v1024_v29  ;;  %v421_v29 = vld [vmem:[%s1180_s1] sm:$0xf] }
 0x12f   : > { %v513_v18 = vsel %vm512_vm5, %v509_v14, %v511_v9  ;;  %446 = vmatprep.subr.bf16.mxu0 %v403_v26 }
 0x130   : > { %v561_v19 = vsel %vm386_vm4, %v513_v18, %v1029_v31  ;;  %685 = vmatpush1.bf16.msra.mxu1 %v584_v8  ;;  %vm422_vm4 = vcmask 293888  }
 0x131   : > { %686 = vmatprep.subr.bf16.mxu1 %v573_v22  ;;  %v566_v28 = vsel %vm393_vm6, %v561_v19, %v1033_v32 }
 0x132   : > { %v327_v23 = vpop.permute.xlu1 %326  ;;  %v570_v49 = vsel %vm398_vm7, %v566_v28, %v1039_v37 }
 0x133   : > { %v331_v7 = vsel %vm330_vm1, %v327_v23, %v1018_v25  ;;  %v657_v25 = vld [vmem:[%s1183_s4] sm:$0xf]  ;;  %vm664_vm1 = vcmask 818176  }
 0x134   : > { %687 = vmatpush1.bf16.msra.mxu1 %v570_v49  ;;  %v400_v24 = vsel %vm398_vm7, %v1062_v55, %v331_v7  ;;  %vm723_vm7 = vcmask 523268  }
 0x135   : > { %447 = vmatpush1.bf16.msra.mxu0 %v400_v24  ;;  %688 = vmatprep.subr.bf16.mxu1 %v1059_v54  ;;  %vm724_vm9 = vmor %vm723_vm7, %vm393_vm6 }
 0x138   : > { %825 = vmatmul.mubr.msk.bf16.vlgmr.msra.gmra.mxu0 %vm422_vm4, %v421_v29  ;;  %689 = vmatpush1.bf16.msra.mxu1 %v1070_v57  ;;  %v477_v32 = vpop.permute.xlu0 %476 }
 0x13b   : > { %828 = vmatmul.mubr.msk.bf16.vlgmr.msra.gmra.mxu1 %vm664_vm1, %v657_v25 }
 0x13f   : > { %v485_v31 = vpop.permute.xlu1 %484 }
 0x143   : > { %v662_v16 = vpop.permute.xlu1 %661 }
 0x1f8   : > { %v466_v37 = vpop.f32.mrf.mxu0 }
 0x1f9   : > { %v479_v55 = vmul.f32 %v477_v32, %v466_v37 }
 0x1fa   : > { %v468_v54 = vpop.f32.mrf.mxu0 }
 0x1fb   : > { %v487_v27 = vadd.f32 %v485_v31, %v479_v55  ;;  %v480_v30 = vmul.f32 %v477_v32, %v468_v54  ;;  %v708_v33 = vpop.f32.mrf.mxu1 }
 0x1fc   : > { %v470_v34 = vpop.f32.mrf.mxu0  ;;  %v709_v36 = vadd.f32 %v708_v33, %v662_v16 }
 0x1fd   : > { %v488_v35 = vadd.f32 %v485_v31, %v480_v30  ;;  %v710_v57 = vpop.f32.mrf.mxu1  ;;  %v489_v40 = vmax.f32 %v487_v27, 0.0 }
 0x1fe   : > { %v711_v38 = vadd.f32 %v710_v57, %v662_v16  ;;  %v471_v39 = vpop.f32.mrf.mxu0 }
 0x1ff   : > { %v490_v41 = vmax.f32 %v488_v35, 0.0  ;;  %v712_v42 = vpop.f32.mrf.mxu1 }
 0x200   : > { %v835_v43 = vpack.c.bf16 %v711_v38, %v709_v36 }
 0x201   : > { %v834_v44 = vpack.c.bf16 %v490_v41, %v489_v40  ;;  %v713_v45 = vpop.f32.mrf.mxu1 }
 0x202   : > { %725 = vst.msk [vmem:[%s291_s16] sm:$0xff] %vm724_vm9, %v835_v43 }
 0x203   : > { %501 = vst.msk [vmem:[%s286_s25] sm:$0xff] %vm500_vm10, %v834_v44 }
 0x204 PF: > { %s18_s24 = sadd.s32 1, %s874_s24  }
 0x205   : > { %p15_p4 = scmp.ge.s32.totalorder %s18_s24, 4  }
 0x207   :  { %17 = sbr.rel (!%p15_p4) target bundleno = 1 (0x1), region = 86 }

// kernel: cba_block_forward.3
= control target key start
LH: loop header
LB: loop body
LE: loop exit
PB: predicated region body
PF: predicated region fallthrough
CT: control target
= control target key end

     0   :  { %s1750_s23 = smov 0   ;;  %s2439_s0 = inlined_call_operand.vmem [shape: bf16[2,8,240], index: 0, kind: input, shape index: {}]   ;;  %s2440_s1 = inlined_call_operand.vmem [shape: bf16[2,8,192], index: 1, kind: input, shape index: {}]   ;;  %s2441_s2 = inlined_call_operand.vmem [shape: bf16[8,72], index: 2, kind: input, shape index: {}]   ;;  %s2442_s3 = inlined_call_operand.vmem [shape: f32[8,1], index: 3, kind: input, shape index: {}]   ;;  %s2443_s4 = inlined_call_operand.vmem [shape: f32[8,1], index: 4, kind: input, shape index: {}]   ;;  %s2444_s5 = inlined_call_operand.vmem [shape: f32[4,8], index: 5, kind: input, shape index: {}]   ;;  %s2445_s6 = inlined_call_operand.vmem [shape: f32[4,1], index: 6, kind: input, shape index: {}]   ;;  %s2446_s7 = inlined_call_operand.vmem [shape: f32[8,4], index: 7, kind: input, shape index: {}]   ;;  %s2447_s8 = inlined_call_operand.vmem [shape: f32[8,1], index: 8, kind: input, shape index: {}]   ;;  %s2448_s9 = inlined_call_operand.<no memory space> [shape: f32[1,1], index: 9, kind: input, shape index: {}]   ;;  %s2449_s10 = inlined_call_operand.vmem [shape: f32[1,98], index: 10, kind: input, shape index: {}]   ;;  %s2450_s11 = inlined_call_operand.vmem [shape: f32[1,192], index: 11, kind: input, shape index: {}]   ;;  %s2451_s12 = inlined_call_operand.vmem [shape: f32[2,8,192], index: 12, kind: output, shape index: {}]  }
   0x1   :  { %v17_v0 = vstv %s2448_s9 }
   0x2   :  { %18 = vst [vmem:[#allocation2] sm:$0x1] %v17_v0 }
   0x3 LB: > { %s1536_s24 = sadd.s32 4294967295, %s1650_s23   ;;  %p1540_p0 = scmp.ge.s32.totalorder %s1650_s23, 1  ;;  %s1650_s23 = sphi %s1750_s23, %s24_s23  }
   0x4   : > { %p374_p1 = scmp.lt.s32.totalorder %s1650_s23, 3 }
   0x6   : > { %p375_p2 = pnand %p1540_p0, %p374_p1 }
   0x7   : > { %p421_p3 = scmp.lt.s32.totalorder (!%p375_p2), %s1536_s24, 1  ;;  %s1652_s28 = smov (!%p375_p2), 96  }
   0x8   : > { %378 = sbr.rel (%p375_p2) target bundleno = 1927 (0x787), region = 68  ;;  %s2453_s29 = smov (!%p375_p2), 94  }
   0x9   : > { %s1654_s30 = smov (!%p375_p2), 95   ;;  %s1655_s13 = smov (!%p375_p2), 111  }
   0xa   : > { %s1656_s14 = smov (!%p375_p2), 110   ;;  %s1658_s15 = smov (!%p375_p2), 126  }
   0xb   : > { %s1659_s16 = smov (!%p375_p2), 112   ;;  %s1660_s17 = smov (!%p375_p2), 127  }
   0xc   : > { %s1663_s26 = smov (!%p375_p2), 115   ;;  %s1665_s20 = smov (!%p375_p2), 98  }
   0xd   : > { %s2481_s24 = smov (!%p421_p3, %s1536_s24), 1  ;;  %v1657_v4 = vmov 0   ;;  %v576_v5 = vld [vmem:[%s2442_s3] sm:$0xff]  ;;  %vm491_vm0 = vcmask 1043456   ;;  %vm2456_vm1 = vcmask 769024   ;;  %vm477_vm2 = vcmask 785408  }
   0xe   : > { %s2452_s9 = sshll.u32 %s2481_s24, 3  ;;  %567 = vmatprep.mubr.bf16.mxu0 %v1657_v4  ;;  %1618 = vset.pattern.permute.xlu0 %v1657_v4  ;;  %v584_v6 = vld [vmem:[%s2443_s4] sm:$0xff]  ;;  %vm483_vm3 = vcmask 777216   ;;  %vm465_vm4 = vcmask 908288   ;;  %vm471_vm5 = vcmask 900096   ;;  %vm453_vm6 = vcmask 1031168  }
   0xf   : > { %s425_s27 = scalar_lea.vmem %s2439_s0, %s2452_s9  ;;  %1619 = vset.pattern.permute.xlu1 %v1657_v4  ;;  %vm459_vm7 = vcmask 916480   ;;  %vm447_vm8 = vcmask 1039360   ;;  %v524_v40 = vld [vmem:[%s2441_s2] sm:$0xf]  ;;  %vm525_vm9 = vcmask 588800   ;;  %v594_v41 = vlaneseq  ;;  %s1666_s21 = smov 97  }
  0x10   : > { %v437_v1 = vld [vmem:[%s425_s27] sm:$0xff]  ;;  %vm2455_vm10 = vcmask 523264   ;;  %v1661_v62 = vmov 0.0   ;;  %vm1662_vm11 = vmmov 0   ;;  %vm614_vm12 = vcmask 64512   ;;  %s1664_s27 = smov 99  }
  0x11   : > { %v1766_v2 = vcombine.low %v437_v1, %v437_v1  ;;  %v1772_v3 = vcombine.high %v437_v1, %v437_v1  ;;  %v595_v42 = vshrl.u32 %v594_v41, 7  ;;  %v592_v49 = vld [vmem:[%s2450_s11] sm:$0x3]  ;;  %1575 = vmatprep.subr.mxu1 %v1661_v62  ;;  %1577 = vmatprep.mubr.msk.f32.mxu1 %vm1662_vm11, %v1661_v62  ;;  %vm700_vm14 = vcmask 31744   ;;  %s1667_s22 = smov 100   ;;  %s1668_s25 = smov 114  }
  0x12   : > { %v612_v1 = vld [vmem:[%s2444_s5] sm:$0xf]  ;;  %s1669_s18 = smov 113   ;;  %s1670_s19 = smov 109   ;;  %vm831_vm15 = vcmask 1040384  }
  0x13   : > { %473 = vrot.lane.b32.xlu1 %v1766_v2, %s1652_s28  ;;  %485 = vrot.lane.b32.xlu0 %v1766_v2, %s2453_s29  ;;  %v600_v44 = vsub.s32 1, %v595_v42  ;;  %v1831_v46 = vsub.s32 0, %v595_v42  ;;  %v1552_v4 = vld [vmem:[#allocation2] ss:$0 sm:$0xff]  ;;  %s1671_s9 = smov 116  }
  0x15   : > { %v1836_v52 = vrot.slane %v592_v49, %v600_v44  ;;  %v1841_v55 = vrot.slane %v592_v49, %v1831_v46 }
  0x17   : > { %475 = vrot.lane.b32.xlu1 %v1772_v3, %s1652_s28  ;;  %487 = vrot.lane.b32.xlu0 %v1772_v3, %s2453_s29  ;;  %s1672_s29 = smov 64  }
  0x1b   : > { %481 = vrot.lane.b32.xlu1 %v1772_v3, %s1654_s30  ;;  %479 = vrot.lane.b32.xlu0 %v1766_v2, %s1654_s30 }
  0x1f   : > { %463 = vrot.lane.b32.xlu1 %v1772_v3, %s1655_s13  ;;  %461 = vrot.lane.b32.xlu0 %v1766_v2, %s1655_s13 }
  0x23   : > { %469 = vrot.lane.b32.xlu1 %v1772_v3, %s1656_s14  ;;  %467 = vrot.lane.b32.xlu0 %v1766_v2, %s1656_s14 }
  0x27   : > { %451 = vrot.lane.b32.xlu1 %v1772_v3, %s1658_s15  ;;  %449 = vrot.lane.b32.xlu0 %v1766_v2, %s1658_s15 }
  0x2b   : > { %457 = vrot.lane.b32.xlu1 %v1772_v3, %s1659_s16  ;;  %455 = vrot.lane.b32.xlu0 %v1766_v2, %s1659_s16 }
  0x2f   : > { %445 = vrot.lane.b32.xlu1 %v1772_v3, %s1660_s17  ;;  %443 = vrot.lane.b32.xlu0 %v1766_v2, %s1660_s17 }
  0x33   : > { %579 = vperm.xlu0 %1618, %v576_v5   ;;  %587 = vperm.xlu1 %1619, %v584_v6  }
  0x85   : > { %v474_v7 = vpop.permute.xlu1 %473  ;;  %v486_v8 = vpop.permute.xlu0 %485 }
  0x89   : > { %v476_v9 = vpop.permute.xlu1 %475  ;;  %v488_v10 = vpop.permute.xlu0 %487 }
  0x8a   : > { %1549 = vmatprep.subr.msk.bf16.mxu0 %vm491_vm0, %v488_v10  ;;  %v490_v11 = vsel %vm2456_vm1, %v486_v8, %v488_v10  ;;  %v478_v15 = vsel %vm477_vm2, %v474_v7, %v476_v9  ;;  %v698_v8 = vld [vmem:[%s2446_s7] sm:$0xff]  ;;  %v1014_v10 = vrot.slane %v1661_v62, 6  ;;  %vm1001_vm1 = vcmask 932864  }
  0x8b   : > { %v530_v12 = vsel %vm491_vm0, %v490_v11, 0  ;;  %v1872_v11 = vrot.slane %v1661_v62, 2 }
  0x8c   : > { %542 = vmatpush1.bf16.msra.mxu0 %v530_v12  ;;  %v1019_v12 = vrot.slane %v1661_v62, 4 }
  0x8d   : > { %v482_v13 = vpop.permute.xlu1 %481  ;;  %v480_v14 = vpop.permute.xlu0 %479 }
  0x8e   : > { %v484_v16 = vsel %vm483_vm3, %v480_v14, %v482_v13  ;;  %v522_v17 = vsel %vm491_vm0, %v476_v9, %v482_v13  ;;  %v699_v13 = vld [vmem:[%s2447_s8] sm:$0xff] }
  0x8f   : > { %543 = vmatprep.subr.bf16.mxu0 %v522_v17  ;;  %v518_v18 = vsel %vm491_vm0, %v478_v15, %v484_v16 }
  0x90   : > { %544 = vmatpush1.bf16.msra.mxu0 %v518_v18 }
  0x91   : > { %v464_v19 = vpop.permute.xlu1 %463  ;;  %v462_v20 = vpop.permute.xlu0 %461 }
  0x92   : > { %v466_v23 = vsel %vm465_vm4, %v462_v20, %v464_v19 }
  0x95   : > { %v470_v21 = vpop.permute.xlu1 %469  ;;  %v468_v22 = vpop.permute.xlu0 %467 }
  0x96   : > { %v472_v24 = vsel %vm471_vm5, %v468_v22, %v470_v21  ;;  %v514_v25 = vsel %vm491_vm0, %v464_v19, %v470_v21 }
  0x97   : > { %545 = vmatprep.subr.bf16.mxu0 %v514_v25  ;;  %v510_v26 = vsel %vm491_vm0, %v466_v23, %v472_v24 }
  0x98   : > { %546 = vmatpush1.bf16.msra.mxu0 %v510_v26 }
  0x99   : > { %v452_v27 = vpop.permute.xlu1 %451  ;;  %v450_v28 = vpop.permute.xlu0 %449 }
  0x9a   : > { %v454_v31 = vsel %vm453_vm6, %v450_v28, %v452_v27 }
  0x9d   : > { %v458_v29 = vpop.permute.xlu1 %457  ;;  %v456_v30 = vpop.permute.xlu0 %455 }
  0x9e   : > { %v460_v32 = vsel %vm459_vm7, %v456_v30, %v458_v29  ;;  %v506_v33 = vsel %vm491_vm0, %v452_v27, %v458_v29 }
  0x9f   : > { %547 = vmatprep.subr.bf16.mxu0 %v506_v33  ;;  %v502_v34 = vsel %vm491_vm0, %v454_v31, %v460_v32 }
  0xa0   : > { %548 = vmatpush1.bf16.msra.mxu0 %v502_v34 }
  0xa1   : > { %v446_v35 = vpop.permute.xlu1 %445  ;;  %v444_v36 = vpop.permute.xlu0 %443 }
  0xa2   : > { %v448_v37 = vsel %vm447_vm8, %v444_v36, %v446_v35  ;;  %v498_v38 = vsel %vm491_vm0, %v1772_v3, %v446_v35 }
  0xa3   : > { %549 = vmatprep.subr.bf16.mxu0 %v498_v38  ;;  %v494_v39 = vsel %vm491_vm0, %v1766_v2, %v448_v37  ;;  %v613_v2 = vld [vmem:[%s2445_s6] sm:$0xf] }
  0xa4   : > { %550 = vmatpush1.bf16.msra.mxu0 %v494_v39 }
  0xa5   : > { %1570 = vmatprep.subr.mxu0 %v1661_v62 }
  0xa7   : > { %1550 = vmatmul.mubr.msk.bf16.vlgmr.msra.gmra.mxu0 %vm525_vm9, %v524_v40  ;;  %vm971_vm9 = vcmask 1041408  }
  0xa8   : > { %1572 = vmatprep.mubr.msk.f32.mxu0 %vm1662_vm11, %v1661_v62  ;;  %vm976_vm11 = vcmask 1045504  }
  0xae   : > { %v580_v43 = vpop.permute.xlu0 %579  ;;  %v588_v48 = vpop.permute.xlu1 %587 }
 0x167   : > { %v569_v45 = vpop.f32.mrf.mxu0 }
 0x168   : > { %v582_v47 = vmul.f32 %v580_v43, %v569_v45 }
 0x169   : > { %v571_v50 = vpop.f32.mrf.mxu0 }
 0x16a   : > { %v583_v51 = vmul.f32 %v580_v43, %v571_v50  ;;  %v1838_v53 = vadd.f32 %v588_v48, %v582_v47 }
 0x16b   : > { %v573_v54 = vpop.f32.mrf.mxu0 }
 0x16c   : > { %v1843_v56 = vadd.f32 %v588_v48, %v583_v51  ;;  %v604_v59 = vmul.f32 %v1841_v55, %v1838_v53 }
 0x16d   : > { %v574_v57 = vpop.f32.mrf.mxu0 }
 0x16e   : > { %v605_v58 = vmul.f32 %v1836_v52, %v1843_v56 }
 0x170   : > { %v607_v60 = vsel %vm2455_vm10, %v605_v58, 0.0 }
 0x171   : > { %v608_v61 = vadd.f32 %v607_v60, %v604_v59 }
 0x173   : > { %609 = vadd.xlane.f32.xlu1 %v608_v61 }
 0x184   : > { %1015 = vrot.lane.b32.xlu1 %v1014_v10, %s1656_s14 }
 0x188   : > { %1123 = vrot.lane.b32.xlu1 %v1661_v62, %s1655_s13 }
 0x18c   : > { %1100 = vrot.lane.b32.xlu1 %v1661_v62, %s1663_s26 }
 0x190   : > { %1145 = vrot.lane.b32.xlu1 %v1872_v11, %s1664_s27 }
 0x194   : > { %1074 = vrot.lane.b32.xlu1 %v1014_v10, %s1660_s17 }
 0x198   : > { %1079 = vrot.lane.b32.xlu1 %v1019_v12, %s1658_s15 }
 0x19c   : > { %1020 = vrot.lane.b32.xlu1 %v1019_v12, %s1670_s19 }
 0x1fc   : > { %v610_v63 = vpop.xlane.xlu1 %609 }
 0x1fd   : > { %v611_v0 = vmul.f32 0.0069444445, %v610_v63 }
 0x1ff   : > { %1571 = vmatpush3.msra.mxu0 %v611_v0 }
 0x200   : > { %1573 = vmatmul.mubr.msk.f32.vlgmr.msra.gmra.mxu0 %vm614_vm12, %v612_v1  ;;  %vm2457_vm12 = vcmask 941056  }
 0x2c0   : > { %v684_v3 = vpop.f32.mrf.mxu0 }
 0x2c1   : > { %v685_v5 = vadd.f32 %v684_v3, %v613_v2 }
 0x2c2   : > { %v1574_v6 = vpop.f32.mrf.mxu0 }
 0x2c3   : > { %v696_v7 = vmul.f32 %v1552_v4, %v685_v5  ;;  %vm688_vm13 = vcmp.ge.f32.partialorder %v685_v5, 0.0 }
 0x2c5   : > { %v697_v9 = vsel %vm688_vm13, %v685_v5, %v696_v7  ;;  %vm1046_vm13 = vcmask 793600  }
 0x2c6   : > { %1576 = vmatpush3.msk.msra.mxu1 %vm491_vm0, %v697_v9 }
 0x2c7   : > { %1578 = vmatmul.mubr.msk.f32.vlgmr.msra.gmra.mxu1 %vm700_vm14, %v698_v8  ;;  %vm1135_vm14 = vcmask 818176  }
 0x2c8   : > { %1431 = vmatprep.mubr.f32.mxu1 %v1661_v62 }
 0x387   : > { %v773_v14 = vpop.f32.mrf.mxu1 }
 0x388   : > { %v774_v15 = vadd.f32 %v773_v14, %v699_v13 }
 0x389   : > { %v1579_v16 = vpop.f32.mrf.mxu1 }
 0x38a   : > { %v1555_v17 = vmul.f32 -1.442695, %v774_v15  ;;  %v1977_v16 = vpop.permute.xlu1 %1015 }
 0x38c   : > { %1632 = vpow2.f32 %v1555_v17 }
 0x38e   : > { %v1982_v17 = vpop.permute.xlu1 %1123 }
 0x399   : > { %v1633_v18 = vpop.eup %1632 }
 0x39a   : > { %v780_v19 = vadd.f32 1.0, %v1633_v18 }
 0x39c   : > { %1634 = vrcp.f32 %v780_v19 }
 0x3a9   : > { %v1635_v20 = vpop.eup %1634 }
 0x3aa   : > { %785 = vperm.xlu0 %1618, %v1635_v20   ;;  %v1997_v20 = vpop.permute.xlu1 %1100 }
 0x3ae   : > { %1033 = vrot.lane.b32.xlu0 %v1661_v62, %s1665_s20 }
 0x3b2   : > { %1044 = vrot.lane.b32.xlu0 %v1014_v10, %s1666_s21 }
 0x3b6   : > { %1051 = vrot.lane.b32.xlu0 %v1019_v12, %s1652_s28 }
 0x3ba   : > { %1055 = vrot.lane.b32.xlu0 %v1872_v11, %s1654_s30 }
 0x3be   : > { %1133 = vrot.lane.b32.xlu0 %v1019_v12, %s1667_s22 }
 0x3c2   : > { %1108 = vrot.lane.b32.xlu0 %v1014_v10, %s1668_s25 }
 0x3c6   : > { %1113 = vrot.lane.b32.xlu0 %v1019_v12, %s1669_s18 }
 0x3ca   : > { %1118 = vrot.lane.b32.xlu0 %v1872_v11, %s1659_s16 }
 0x3ce   : > { %1088 = vrot.lane.b32.xlu0 %v1872_v11, %s1671_s9 }
 0x425   : > { %v786_v21 = vpop.permute.xlu0 %785 }
 0x426   : > { %v788_v22 = vmul.f32 %v786_v21, %v1838_v53  ;;  %v789_v23 = vmul.f32 %v786_v21, %v1843_v56 }
 0x428   : > { %v1899_v24 = vmul.f32 %v788_v22, %v1838_v53  ;;  %v1902_v25 = vmul.f32 %v789_v23, %v1843_v56  ;;  %v2004_v22 = vpop.permute.xlu1 %1145 }
 0x429   : > { %v1915_v1 = vpop.permute.xlu0 %1033 }
 0x42a   : > { %v792_v26 = vrot.slane %v1899_v24, 4  ;;  %v798_v27 = vsel %vm2455_vm10, %v1902_v25, 0.0  ;;  %v816_v28 = vsel %vm2455_vm10, %v1902_v25, -inf }
 0x42b   : > { %v799_v29 = vrot.slane %v798_v27, 4  ;;  %v817_v30 = vrot.slane %v816_v28, 4 }
 0x42c   : > { %v793_v31 = vadd.f32 %v792_v26, %v1899_v24  ;;  %v811_v32 = vmax.f32 %v1899_v24, %v792_v26  ;;  %v2009_v23 = vpop.permute.xlu1 %1074 }
 0x42d   : > { %v800_v33 = vadd.f32 %v799_v29, %v798_v27  ;;  %v818_v34 = vmax.f32 %v816_v28, %v817_v30  ;;  %v1917_v2 = vpop.permute.xlu0 %1044  ;;  %v1158_v27 = vsel %vm971_vm9, 0.0, %v2009_v23 }
 0x42e   : > { %v794_v35 = vrot.slane %v793_v31, 2  ;;  %v812_v36 = vrot.slane %v811_v32, 2 }
 0x42f   : > { %v801_v37 = vrot.slane %v800_v33, 2  ;;  %v819_v38 = vrot.slane %v818_v34, 2 }
 0x430   : > { %v795_v39 = vadd.f32 %v794_v35, %v793_v31  ;;  %v813_v40 = vmax.f32 %v811_v32, %v812_v36  ;;  %v2021_v28 = vpop.permute.xlu1 %1079 }
 0x431   : > { %v802_v41 = vadd.f32 %v801_v37, %v800_v33  ;;  %v820_v42 = vmax.f32 %v818_v34, %v819_v38  ;;  %v1919_v3 = vpop.permute.xlu0 %1051  ;;  %v1160_v30 = vsel %vm491_vm0, %v1158_v27, %v2021_v28  ;;  %v1174_v34 = vsel %vm971_vm9, %v1982_v17, %v1977_v16 }
 0x432   : > { %v796_v43 = vrot.slane %v795_v39, 1  ;;  %v814_v44 = vrot.slane %v813_v40, 1 }
 0x433   : > { %v803_v45 = vrot.slane %v802_v41, 1  ;;  %v821_v47 = vrot.slane %v820_v42, 1 }
 0x434   : > { %v797_v48 = vadd.f32 %v796_v43, %v795_v39  ;;  %v815_v49 = vmax.f32 %v813_v40, %v814_v44  ;;  %v2067_v39 = vpop.permute.xlu1 %1020 }
 0x435   : > { %v804_v50 = vadd.f32 %v803_v45, %v802_v41  ;;  %v822_v51 = vmax.f32 %v820_v42, %v821_v47  ;;  %v1921_v4 = vpop.permute.xlu0 %1055 }
 0x436   : > { %v806_v53 = vmul.f32 0.125, %v797_v48  ;;  %v823_v54 = vmul.f32 %v815_v49, %v1841_v55 }
 0x437   : > { %v807_v56 = vmul.f32 0.125, %v804_v50  ;;  %v824_v57 = vmul.f32 %v822_v51, %v1836_v52 }
 0x438   : > { %v808_v58 = vmul.f32 %v806_v53, %v1841_v55  ;;  %v827_v59 = vrot.slane %v823_v54, 7 }
 0x439   : > { %v809_v61 = vmul.f32 %v807_v56, %v1836_v52  ;;  %v828_v63 = vrot.slane %v824_v57, 7  ;;  %v1923_v5 = vpop.permute.xlu0 %1133 }
 0x43a   : > { %v832_v60 = vsel %vm831_vm15, %v808_v58, %v827_v59  ;;  %v1177_v36 = vsel %vm491_vm0, %v1174_v34, %v1923_v5 }
 0x43b   : > { %836 = vrot.lane.b32.xlu0 %v832_v60, %s1672_s29  ;;  %v833_v0 = vsel %vm831_vm15, %v809_v61, %v828_v63  ;;  %vm1035_vm15 = vcmask 801792  }
 0x43d   : > { %v1925_v55 = vpop.permute.xlu0 %1108 }
 0x43e   : > { %v1166_v26 = vsel %vm971_vm9, %v1997_v20, %v1925_v55 }
 0x43f   : > { %838 = vrot.lane.b32.xlu0 %v833_v0, %s1672_s29  ;;  %s1673_s29 = smov 124  }
 0x441   : > { %v1927_v6 = vpop.permute.xlu0 %1113 }
 0x442   : > { %v1169_v29 = vsel %vm491_vm0, %v1166_v26, %v1927_v6 }
 0x445   : > { %v1929_v52 = vpop.permute.xlu0 %1118 }
 0x446   : > { %v1172_v31 = vsel %vm976_vm11, %v1169_v29, %v1929_v52 }
 0x449   : > { %v1931_v7 = vpop.permute.xlu0 %1088 }
 0x44a   : > { %v1163_v32 = vsel %vm976_vm11, %v1160_v30, %v1931_v7 }
 0x44b   : > { %v1625_v33 = vpack.i.bf16 %v1163_v32, %v1172_v31 }
 0x4ad   : > { %v837_v8 = vpop.permute.xlu0 %836 }
 0x4ae   : > { %v1934_v9 = vsel %vm2455_vm10, 0.0, %v837_v8 }
 0x4af   : > { %1096 = vrot.lane.b32.xlu1 %v1934_v9, %s1663_s26  ;;  %1029 = vrot.lane.b32.xlu0 %v1934_v9, %s1665_s20  ;;  %v1947_v13 = vrot.slane %v1934_v9, 4  ;;  %v1953_v14 = vrot.slane %v1934_v9, 6  ;;  %v865_v15 = vrot.slane %v1934_v9, 2 }
 0x4b1   : > { %v839_v10 = vpop.permute.xlu0 %838 }
 0x4b2   : > { %v1941_v12 = vsel %vm2455_vm10, %v837_v8, %v839_v10  ;;  %vm1147_vm10 = vcmask 809984  }
 0x4b3   : > { %907 = vrot.lane.b32.xlu0 %v1934_v9, %s1655_s13  ;;  %877 = vrot.lane.b32.xlu1 %v1941_v12, %s1673_s29  ;;  %v1988_v18 = vrot.slane %v1941_v12, 4  ;;  %v1991_v19 = vrot.slane %v1941_v12, 6  ;;  %v866_v21 = vrot.slane %v1941_v12, 2 }
 0x4b7   : > { %875 = vrot.lane.b32.xlu0 %v1934_v9, %s1673_s29  ;;  %955 = vrot.lane.b32.xlu1 %v1947_v13, %s1652_s28 }
 0x4bb   : > { %915 = vrot.lane.b32.xlu1 %v1953_v14, %s1656_s14  ;;  %1031 = vrot.lane.b32.xlu0 %v1941_v12, %s1665_s20  ;;  %s1675_s20 = smov 125  }
 0x4bf   : > { %963 = vrot.lane.b32.xlu1 %v865_v15, %s1654_s30  ;;  %909 = vrot.lane.b32.xlu0 %v1941_v12, %s1655_s13  ;;  %s1674_s13 = smov 108  }
 0x4c3   : > { %997 = vrot.lane.b32.xlu1 %v1953_v14, %s1668_s25  ;;  %1098 = vrot.lane.b32.xlu0 %v1941_v12, %s1663_s26 }
 0x4c7   : > { %1141 = vrot.lane.b32.xlu1 %v865_v15, %s1664_s27  ;;  %1040 = vrot.lane.b32.xlu0 %v1953_v14, %s1666_s21 }
 0x4cb   : > { %847 = vrot.lane.b32.xlu1 %v1953_v14, %s1660_s17  ;;  %1129 = vrot.lane.b32.xlu0 %v1947_v13, %s1667_s22 }
 0x4cf   : > { %899 = vrot.lane.b32.xlu1 %v865_v15, %s1659_s16  ;;  %1005 = vrot.lane.b32.xlu0 %v1947_v13, %s1669_s18 }
 0x4d3   : > { %857 = vrot.lane.b32.xlu1 %v1947_v13, %s1658_s15  ;;  %1084 = vrot.lane.b32.xlu0 %v865_v15, %s1671_s9 }
 0x4d7   : > { %923 = vrot.lane.b32.xlu1 %v1947_v13, %s1670_s19  ;;  %931 = vrot.lane.b32.xlu0 %v865_v15, %s1674_s13 }
 0x4db   : > { %1131 = vrot.lane.b32.xlu1 %v1988_v18, %s1667_s22  ;;  %1042 = vrot.lane.b32.xlu0 %v1991_v19, %s1666_s21  ;;  %s2478_s21 = sshll.u32 %s2481_s24, 3 }
 0x4df   : > { %1007 = vrot.lane.b32.xlu1 %v1988_v18, %s1669_s18  ;;  %957 = vrot.lane.b32.xlu0 %v1988_v18, %s1652_s28  ;;  %s1677_s28 = smov 60   ;;  %s430_s18 = scalar_lea.vmem %s2440_s1, %s2478_s21 }
 0x4e3   : > { %1086 = vrot.lane.b32.xlu1 %v866_v21, %s1671_s9  ;;  %917 = vrot.lane.b32.xlu0 %v1991_v19, %s1656_s14  ;;  %s1676_s9 = smov 26   ;;  %s1679_s14 = smov 106  }
 0x4e7   : > { %933 = vrot.lane.b32.xlu1 %v866_v21, %s1674_s13  ;;  %965 = vrot.lane.b32.xlu0 %v866_v21, %s1654_s30  ;;  %s1678_s30 = smov 107  }
 0x4eb   : > { %867 = vrot.lane.b32.xlu1 %v865_v15, %s1675_s20  ;;  %999 = vrot.lane.b32.xlu0 %v1991_v19, %s1668_s25 }
 0x4ef   : > { %1256 = vrot.lane.b32.xlu1 %v1934_v9, %s1676_s9  ;;  %1143 = vrot.lane.b32.xlu0 %v866_v21, %s1664_s27 }
 0x4f3   : > { %1260 = vrot.lane.b32.xlu1 %v1661_v62, %s1676_s9  ;;  %849 = vrot.lane.b32.xlu0 %v1991_v19, %s1660_s17  ;;  %v1181_v62 = vsel %vm971_vm9, %v1915_v1, %v1917_v2  ;;  %s1681_s17 = smov 122  }
 0x4f4   : > { %v1182_v35 = vsel %vm491_vm0, %v1181_v62, %v1919_v3 }
 0x4f5   : > { %v1183_v37 = vsel %vm976_vm11, %v1182_v35, %v1921_v4 }
 0x4f7   : > { %901 = vrot.lane.b32.xlu0 %v866_v21, %s1659_s16  ;;  %1626 = vrot.lane.b32.xlu1 %v1625_v33, %s1677_s28  ;;  %s2459_s16 = smov 94  }
 0x4fb   : > { %859 = vrot.lane.b32.xlu0 %v1988_v18, %s1658_s15  ;;  %941 = vrot.lane.b32.xlu1 %v1941_v12, %s1678_s30  ;;  %s1680_s15 = smov 123  }
 0x4ff   : > { %925 = vrot.lane.b32.xlu0 %v1988_v18, %s1670_s19  ;;  %949 = vrot.lane.b32.xlu1 %v1991_v19, %s1679_s14  ;;  %s1565_s19 = sshll.u32 %s2481_s24, 4 }
 0x503   : > { %1025 = vrot.lane.b32.xlu0 %v1872_v11, %s1674_s13  ;;  %v1180_v11 = vsel %vm976_vm11, %v1177_v36, %v2004_v22 }
 0x504   : > { %v1620_v38 = vpack.i.bf16 %v1180_v11, %v1183_v37 }
 0x507   : > { %869 = vrot.lane.b32.xlu0 %v866_v21, %s1675_s20  ;;  %s435_s20 = scalar_lea.vmem %s2451_s12, %s1565_s19 }
 0x50b   : > { %1258 = vrot.lane.b32.xlu0 %v1941_v12, %s1676_s9 }
 0x50f   : > { %1621 = vrot.lane.b32.xlu0 %v1620_v38, %s1677_s28 }
 0x513   : > { %939 = vrot.lane.b32.xlu0 %v1934_v9, %s1678_s30 }
 0x517   : > { %947 = vrot.lane.b32.xlu0 %v1953_v14, %s1679_s14 }
 0x51b   : > { %883 = vrot.lane.b32.xlu0 %v1953_v14, %s1680_s15 }
 0x521   : > { %v1030_v40 = vpop.permute.xlu0 %1029  ;;  %v1097_v41 = vpop.permute.xlu1 %1096 }
 0x525   : > { %v908_v42 = vpop.permute.xlu0 %907  ;;  %v2069_v43 = vpop.permute.xlu1 %877 }
 0x529   : > { %v2071_v44 = vpop.permute.xlu0 %875  ;;  %v956_v45 = vpop.permute.xlu1 %955 }
 0x52d   : > { %v2073_v47 = vpop.permute.xlu0 %1031  ;;  %v916_v48 = vpop.permute.xlu1 %915 }
 0x52e   : > { %v1036_v36 = vsel %vm1035_vm15, %v1030_v40, %v2073_v47 }
 0x531   : > { %v2075_v49 = vpop.permute.xlu0 %909  ;;  %v964_v50 = vpop.permute.xlu1 %963 }
 0x532   : > { %v912_v51 = vsel %vm465_vm4, %v908_v42, %v2075_v49 }
 0x535   : > { %v1099_v53 = vpop.permute.xlu0 %1098  ;;  %v2079_v54 = vpop.permute.xlu1 %997 }
 0x536   : > { %v2082_v56 = vsel %vm2457_vm12, %v1097_v41, %v1099_v53 }
 0x539   : > { %v1041_v57 = vpop.permute.xlu0 %1040  ;;  %v2084_v58 = vpop.permute.xlu1 %1141 }
 0x53d   : > { %v1130_v59 = vpop.permute.xlu0 %1129  ;;  %v848_v60 = vpop.permute.xlu1 %847 }
 0x541   : > { %v2086_v61 = vpop.permute.xlu0 %1005  ;;  %v2088_v63 = vpop.permute.xlu1 %899 }
 0x545   : > { %v2090_v0 = vpop.permute.xlu0 %1084  ;;  %v2092_v8 = vpop.permute.xlu1 %857 }
 0x549   : > { %v2094_v10 = vpop.permute.xlu0 %931  ;;  %v2096_v14 = vpop.permute.xlu1 %923 }
 0x54d   : > { %v2098_v15 = vpop.permute.xlu0 %1042  ;;  %v1132_v21 = vpop.permute.xlu1 %1131 }
 0x54e   : > { %v1047_v31 = vsel %vm1046_vm13, %v1041_v57, %v2098_v15  ;;  %v1136_v62 = vsel %vm1135_vm14, %v1130_v59, %v1132_v21 }
 0x54f   : > { %v1068_v11 = vsel %vm971_vm9, %v1036_v36, %v1047_v31  ;;  %v1137_v31 = vsel %vm1135_vm14, %v1132_v21, %v1923_v5  ;;  %v1104_v21 = vsel %vm2457_vm12, %v1099_v53, %v1997_v20  ;;  %vm927_vm14 = vcmask 891904  }
 0x550   : > { %vm879_vm12 = vcmask 1014784  }
 0x551   : > { %v2100_v26 = vpop.permute.xlu0 %957  ;;  %v2102_v27 = vpop.permute.xlu1 %1007 }
 0x552   : > { %v2114_v34 = vsel %vm477_vm2, %v956_v45, %v2100_v26 }
 0x553   : > { %v1070_v45 = vsel %vm491_vm0, %v1068_v11, %v2114_v34 }
 0x555   : > { %v918_v29 = vpop.permute.xlu0 %917  ;;  %v2104_v30 = vpop.permute.xlu1 %1086 }
 0x556   : > { %v920_v32 = vsel %vm471_vm5, %v916_v48, %v918_v29  ;;  %v986_v33 = vsel %vm971_vm9, %v2075_v49, %v918_v29  ;;  %v2140_v48 = vsel %vm471_vm5, %v918_v29, %v1977_v16  ;;  %vm2458_vm5 = vcmask 949248  }
 0x557   : > { %v2117_v35 = vsel %vm971_vm9, %v912_v51, %v920_v32 }
 0x558   : > { %v2123_v37 = vsel %vm491_vm0, %v2117_v35, %v1136_v62 }
 0x559   : > { %v2126_v38 = vpop.permute.xlu0 %965  ;;  %v2128_v41 = vpop.permute.xlu1 %933 }
 0x55a   : > { %v2132_v42 = vsel %vm483_vm3, %v964_v50, %v2126_v38  ;;  %v1125_v50 = vsel %vm465_vm4, %v2075_v49, %v1982_v17  ;;  %vm1009_vm4 = vcmask 924672  }
 0x55b   : > { %v1072_v40 = vsel %vm976_vm11, %v1070_v45, %v2132_v42  ;;  %v1173_v59 = vsel %vm971_vm9, %v1125_v50, %v2140_v48  ;;  %v1115_v50 = vsel %vm1009_vm4, %v2102_v27, %v1927_v6 }
 0x55c   : > { %1241 = vrot.lane.b32.xlu0 %v1072_v40, %s1677_s28  ;;  %v1176_v62 = vsel %vm491_vm0, %v1173_v59, %v1137_v31 }
 0x55d   : > { %v1000_v51 = vpop.permute.xlu0 %999  ;;  %v2143_v57 = vpop.permute.xlu1 %867 }
 0x55e   : > { %v1110_v36 = vsel %vm1001_vm1, %v1000_v51, %v1925_v55 }
 0x55f   : > { %v1165_v45 = vsel %vm971_vm9, %v1104_v21, %v1110_v36 }
 0x561   : > { %v2152_v32 = vpop.permute.xlu0 %1143  ;;  %v2154_v16 = vpop.permute.xlu1 %1256 }
 0x562   : > { %v1149_v29 = vsel %vm1147_vm10, %v2152_v32, %v2004_v22  ;;  %v1060_v22 = vsel %vm971_vm9, %v2069_v43, %v1000_v51 }
 0x563   : > { %v1179_v17 = vsel %vm976_vm11, %v1176_v62, %v1149_v29  ;;  %v1062_v31 = vsel %vm491_vm0, %v1060_v22, %v2102_v27  ;;  %v1168_v29 = vsel %vm491_vm0, %v1165_v45, %v1115_v50 }
 0x564   : > { %1237 = vrot.lane.b32.xlu0 %v1179_v17, %s1677_s28 }
 0x565   : > { %v2164_v11 = vpop.permute.xlu0 %849  ;;  %v2166_v5 = vpop.permute.xlu1 %1260 }
 0x566   : > { %v852_v62 = vsel %vm447_vm8, %v848_v60, %v2164_v11  ;;  %v1091_v60 = vsel %vm2458_vm5, %v2090_v0, %v2104_v30  ;;  %vm935_vm5 = vcmask 883712  }
 0x567   : > { %v972_v21 = vsel %vm971_vm9, %v1934_v9, %v852_v62 }
 0x569   : > { %v2176_v55 = vpop.permute.xlu0 %901  ;;  %v2178_v59 = vpop.permute.xlu1 %1626 }
 0x56a   : > { %v1064_v20 = vsel %vm976_vm11, %v1062_v31, %v2176_v55  ;;  %v1120_v53 = vsel %vm459_vm7, %v2176_v55, %v1929_v52 }
 0x56b   : > { %1198 = vrot.lane.b32.xlu1 %v1064_v20, %s2459_s16  ;;  %v1171_v6 = vsel %vm976_vm11, %v1168_v29, %v1120_v53 }
 0x56c   : > { %1231 = vrot.lane.b32.xlu0 %v1171_v6, %s1677_s28  ;;  %v2236_v6 = vsel %vm879_vm12, %v2071_v44, %v2069_v43 }
 0x56d   : > { %v860_v17 = vpop.permute.xlu0 %859  ;;  %v2193_v36 = vpop.permute.xlu1 %941 }
 0x56e   : > { %v862_v52 = vsel %vm453_vm6, %v2092_v8, %v860_v17 }
 0x56f   : > { %v974_v22 = vsel %vm491_vm0, %v972_v21, %v862_v52  ;;  %v936_v21 = vsel %vm935_vm5, %v2094_v10, %v2128_v41  ;;  %v2258_v10 = vsel %vm459_vm7, %v2088_v63, %v2176_v55  ;;  %v1057_v63 = vsel %vm483_vm3, %v2126_v38, %v1921_v4 }
 0x570   : > { %v1161_v45 = vsel %vm976_vm11, %v974_v22, %v1091_v60  ;;  %v1053_v60 = vsel %vm477_vm2, %v2100_v26, %v1919_v3  ;;  %v1148_v4 = vsel %vm1147_vm10, %v2084_v58, %v2152_v32  ;;  %v1076_v58 = vsel %vm447_vm8, %v2164_v11, %v2009_v23 }
 0x571   : > { %v2204_v50 = vpop.permute.xlu0 %925  ;;  %1223 = vrot.lane.b32.xlu0 %v1161_v45, %s1677_s28  ;;  %v2207_v31 = vpop.permute.xlu1 %949  ;;  %v1010_v45 = vsel %vm1009_vm4, %v2086_v61, %v2102_v27  ;;  %v1081_v32 = vsel %vm453_vm6, %v860_v17, %v2021_v28  ;;  %vm1262_vm2 = vcmask 211968   ;;  %vm943_vm3 = vcmask 875520  }
 0x572   : > { %v928_v9 = vsel %vm927_vm14, %v2096_v14, %v2204_v50  ;;  %v988_v8 = vsel %vm491_vm0, %v986_v33, %v2204_v50  ;;  %v992_v0 = vsel %vm971_vm9, %v2193_v36, %v2207_v31  ;;  %v1002_v14 = vsel %vm1001_vm1, %v2079_v54, %v1000_v51 }
 0x573   : > { %v994_v20 = vsel %vm491_vm0, %v992_v0, %v2100_v26  ;;  %v2221_v53 = vsel %vm976_vm11, %v988_v8, %v2128_v41  ;;  %v987_v62 = vsel %vm491_vm0, %v2117_v35, %v928_v9  ;;  %v1059_v52 = vsel %vm971_vm9, %v2236_v6, %v1002_v14 }
 0x574   : > { %v2225_v29 = vsel %vm976_vm11, %v994_v20, %v2126_v38  ;;  %v973_v54 = vsel %vm971_vm9, %v1941_v12, %v2164_v11  ;;  %v1048_v35 = vsel %vm1046_vm13, %v2098_v15, %v1917_v2  ;;  %vm871_vm1 = vcmask 1022976  }
 0x575   : > { %v2229_v33 = vpop.permute.xlu0 %1025  ;;  %1204 = vrot.lane.b32.xlu0 %v1072_v40, %s2459_s16  ;;  %v2247_v40 = vsel %vm976_vm11, %v987_v62, %v936_v21  ;;  %v975_v44 = vsel %vm491_vm0, %v973_v54, %v860_v17  ;;  %v1037_v15 = vsel %vm1035_vm15, %v2073_v47, %v1915_v1  ;;  %v1061_v3 = vsel %vm491_vm0, %v1059_v52, %v1010_v45 }
 0x576   : > { %v1069_v26 = vsel %vm971_vm9, %v1037_v15, %v1048_v35  ;;  %v1063_v61 = vsel %vm976_vm11, %v1061_v3, %v2258_v10  ;;  %v1178_v0 = vsel %vm976_vm11, %v2123_v37, %v1148_v4  ;;  %vm951_vm7 = vcmask 867328  }
 0x577   : > { %v1071_v1 = vsel %vm491_vm0, %v1069_v26, %v1053_v60  ;;  %vm2460_vm6 = vcmask 949248   ;;  %vm1247_vm8 = vcmask 490496   ;;  %vm2461_vm10 = vcmask 769024  }
 0x578   : > { %v1073_v47 = vsel %vm976_vm11, %v1071_v1, %v1057_v63  ;;  %vm2462_vm12 = vmmov %vm2461_vm10  ;;  %vm887_vm13 = vcmask 1006592   ;;  %vm895_vm4 = vcmask 998400  }
 0x579   : > { %v870_v51 = vpop.permute.xlu0 %869  ;;  %1200 = vrot.lane.b32.xlu0 %v2247_v40, %s2459_s16 }
 0x57a   : > { %v2267_v2 = vsel %vm976_vm11, %v975_v44, %v870_v51  ;;  %v872_v27 = vsel %vm871_vm1, %v2143_v57, %v870_v51  ;;  %v1164_v57 = vsel %vm971_vm9, %v2082_v56, %v1002_v14  ;;  %v1157_v56 = vsel %vm971_vm9, %v1941_v12, %v1076_v58 }
 0x57b   : > { %1194 = vrot.lane.b32.xlu1 %v2267_v2, %s2459_s16  ;;  %v2290_v38 = vsel %vm976_vm11, %v974_v22, %v872_v27  ;;  %v1167_v20 = vsel %vm491_vm0, %v1164_v57, %v1010_v45  ;;  %v1159_v23 = vsel %vm491_vm0, %v1157_v56, %v1081_v32  ;;  %vm2465_vm1 = vcmask 941056  }
 0x57c   : > { %v1170_v37 = vsel %vm976_vm11, %v1167_v20, %v2258_v10 }
 0x57d   : > { %v1259_v9 = vpop.permute.xlu0 %1258  ;;  %1196 = vrot.lane.b32.xlu0 %v1063_v61, %s2459_s16 }
 0x57e   : > { %v1263_v28 = vsel %vm1262_vm2, %v2154_v16, %v1259_v9 }
 0x57f   : > { %1243 = vrot.lane.b32.xlu1 %v1073_v47, %s1677_s28 }
 0x581   : > { %v2292_v8 = vpop.permute.xlu0 %1621  ;;  %1192 = vrot.lane.b32.xlu0 %v2290_v38, %s2459_s16 }
 0x582   : > { %v1624_v57 = vunpack.i.h.bf16 %v2292_v8 }
 0x583   : > { %1235 = vrot.lane.b32.xlu1 %v1178_v0, %s1677_s28 }
 0x585   : > { %v940_v22 = vpop.permute.xlu0 %939  ;;  %891 = vrot.lane.b32.xlu0 %v1947_v13, %s1681_s17  ;;  %v1092_v13 = vsel %vm2460_vm6, %v2104_v30, %v1931_v7  ;;  %v1022_v7 = vsel %vm927_vm14, %v2204_v50, %v2067_v39  ;;  %v1027_v30 = vsel %vm935_vm5, %v2128_v41, %v2229_v33  ;;  %v1264_v39 = vsel %vm1262_vm2, %v1259_v9, %v2166_v5  ;;  %vm2463_vm5 = vmmov %vm2461_vm10 }
 0x586   : > { %v944_v12 = vsel %vm943_vm3, %v940_v22, %v2193_v36  ;;  %v1162_v14 = vsel %vm976_vm11, %v1159_v23, %v1092_v13  ;;  %v1065_v36 = vsel %vm971_vm9, %v2075_v49, %v2140_v48  ;;  %v1623_v9 = vunpack.i.l.bf16 %v2292_v8  ;;  %vm2464_vm14 = vmmov %vm2463_vm5 }
 0x587   : > { %1229 = vrot.lane.b32.xlu1 %v1170_v37, %s1677_s28  ;;  %v1628_v22 = vunpack.i.l.bf16 %v2178_v59 }
 0x589   : > { %v948_v11 = vpop.permute.xlu0 %947  ;;  %1319 = vrot.lane.b32.xlu0 %v1263_v28, %s1663_s26 }
 0x58a   : > { %v952_v17 = vsel %vm951_vm7, %v948_v11, %v2207_v31 }
 0x58b   : > { %v991_v62 = vsel %vm971_vm9, %v944_v12, %v952_v17  ;;  %1225 = vrot.lane.b32.xlu1 %v1162_v14, %s1677_s28  ;;  %v1629_v12 = vunpack.i.h.bf16 %v2178_v59 }
 0x58c   : > { %v993_v16 = vsel %vm491_vm0, %v991_v62, %v2114_v34  ;;  %v1066_v34 = vsel %vm491_vm0, %v1065_v36, %v1022_v7 }
 0x58d   : > { %v995_v21 = vsel %vm976_vm11, %v993_v16, %v2132_v42  ;;  %v1067_v42 = vsel %vm976_vm11, %v1066_v34, %v1027_v30  ;;  %v884_v41 = vpop.permute.xlu0 %883 }
 0x58e   : > { %1283 = vrot.lane.b32.xlu0 %v995_v21, %s1663_s26 }
 0x58f   : > { %1206 = vrot.lane.b32.xlu1 %v1073_v47, %s2459_s16 }
 0x593   : > { %1202 = vrot.lane.b32.xlu1 %v1067_v42, %s2459_s16 }
 0x597   : > { %885 = vrot.lane.b32.xlu1 %v1991_v19, %s1680_s15 }
 0x59b   : > { %893 = vrot.lane.b32.xlu1 %v1988_v18, %s1681_s17 }
 0x59f   : > { %1321 = vrot.lane.b32.xlu1 %v1264_v39, %s1663_s26 }
 0x5ce   : > { %v1242_v49 = vpop.permute.xlu0 %1241 }
 0x5d6   : > { %v1238_v48 = vpop.permute.xlu0 %1237 }
 0x5d7   : > { %v1253_v0 = vsel %vm1247_vm8, %v1238_v48, %v1624_v57 }
 0x5dd   : > { %v1199_v50 = vpop.permute.xlu1 %1198 }
 0x5de   : > { %1293 = vrot.lane.b32.xlu1 %v1199_v50, %s1663_s26  ;;  %v1232_v31 = vpop.permute.xlu0 %1231 }
 0x5df   : > { %v1251_v8 = vsel %vm1247_vm8, %v1232_v31, %v1628_v22  ;;  %v1460_v22 = vld [vmem:[%s430_s18] sm:$0xff] }
 0x5e3   : > { %v1224_v33 = vpop.permute.xlu0 %1223 }
 0x5e7   : > { %v1205_v54 = vpop.permute.xlu0 %1204 }
 0x5eb   : > { %v1201_v44 = vpop.permute.xlu0 %1200 }
 0x5ed   : > { %v1195_v52 = vpop.permute.xlu1 %1194 }
 0x5ee   : > { %1289 = vrot.lane.b32.xlu1 %v1195_v52, %s1663_s26 }
 0x5ef   : > { %v1197_v63 = vpop.permute.xlu0 %1196 }
 0x5f0   : > { %v1210_v32 = vsel %vm2463_vm5, %v1197_v63, %v1199_v50 }
 0x5f1   : > { %v1244_v19 = vpop.permute.xlu1 %1243 }
 0x5f2   : > { %v1254_v18 = vsel %vm1247_vm8, %v1242_v49, %v1244_v19  ;;  %v1255_v1 = vsel %vm1247_vm8, %v1244_v19, %v1623_v9 }
 0x5f3   : > { %1315 = vrot.lane.b32.xlu0 %v1254_v18, %s1663_s26  ;;  %v1193_v26 = vpop.permute.xlu0 %1192 }
 0x5f4   : > { %v1209_v28 = vsel %vm2464_vm14, %v1193_v26, %v1195_v52 }
 0x5f5   : > { %v1236_v5 = vpop.permute.xlu1 %1235 }
 0x5f6   : > { %v1252_v35 = vsel %vm1247_vm8, %v1236_v5, %v1238_v48 }
 0x5f7   : > { %1311 = vrot.lane.b32.xlu0 %v1252_v35, %s1663_s26 }
 0x5f9   : > { %v1230_v51 = vpop.permute.xlu1 %1229 }
 0x5fa   : > { %v1250_v60 = vsel %vm1247_vm8, %v1230_v51, %v1232_v31 }
 0x5fb   : > { %1307 = vrot.lane.b32.xlu0 %v1250_v60, %s1663_s26 }
 0x5fd   : > { %v1226_v45 = vpop.permute.xlu1 %1225 }
 0x5fe   : > { %v1248_v15 = vsel %vm1247_vm8, %v1224_v33, %v1226_v45  ;;  %v1249_v14 = vsel %vm1247_vm8, %v1226_v45, %v1629_v12 }
 0x5ff   : > { %1303 = vrot.lane.b32.xlu0 %v1248_v15, %s1663_s26 }
 0x601   : > { %v1207_v3 = vpop.permute.xlu1 %1206 }
 0x602   : > { %1301 = vrot.lane.b32.xlu1 %v1207_v3, %s1663_s26  ;;  %v1212_v27 = vsel %vm2461_vm10, %v1205_v54, %v1207_v3 }
 0x603   : > { %1279 = vrot.lane.b32.xlu0 %v2247_v40, %s1663_s26  ;;  %v892_v40 = vpop.permute.xlu0 %891 }
 0x605   : > { %v1203_v61 = vpop.permute.xlu1 %1202 }
 0x606   : > { %1297 = vrot.lane.b32.xlu1 %v1203_v61, %s1663_s26  ;;  %v1211_v4 = vsel %vm2462_vm12, %v1201_v44, %v1203_v61 }
 0x607   : > { %1299 = vrot.lane.b32.xlu0 %v1212_v27, %s1663_s26  ;;  %v1320_v37 = vpop.permute.xlu0 %1319  ;;  %v1265_v27 = vld [vmem:[%s2449_s10] sm:$0x1] }
 0x609   : > { %v886_v47 = vpop.permute.xlu1 %885 }
 0x60a   : > { %1317 = vrot.lane.b32.xlu1 %v1255_v1, %s1663_s26  ;;  %v888_v20 = vsel %vm887_vm13, %v884_v41, %v886_v47  ;;  %v980_v59 = vsel %vm971_vm9, %v2069_v43, %v886_v47 }
 0x60b   : > { %1295 = vrot.lane.b32.xlu0 %v1211_v4, %s1663_s26  ;;  %v979_v13 = vsel %vm971_vm9, %v2236_v6, %v888_v20 }
 0x60d   : > { %v894_v58 = vpop.permute.xlu1 %893 }
 0x60e   : > { %1313 = vrot.lane.b32.xlu1 %v1253_v0, %s1663_s26  ;;  %v896_v56 = vsel %vm895_vm4, %v892_v40, %v894_v58  ;;  %v982_v62 = vsel %vm491_vm0, %v980_v59, %v894_v58 }
 0x60f   : > { %1291 = vrot.lane.b32.xlu0 %v1210_v32, %s1663_s26  ;;  %v981_v17 = vsel %vm491_vm0, %v979_v13, %v896_v56  ;;  %v984_v16 = vsel %vm976_vm11, %v982_v62, %v2176_v55  ;;  %vm2466_vm0 = vmmov %vm2465_vm1  ;;  %v1462_v13 = vunpack.c.h.bf16 %v1460_v22 }
 0x610   : > { %v983_v6 = vsel %vm976_vm11, %v981_v17, %v2258_v10  ;;  %vm2468_vm11 = vmmov %vm2466_vm0 }
 0x611   : > { %v1322_v23 = vpop.permute.xlu1 %1321  ;;  %vm2469_vm2 = vmmov %vm2466_vm0 }
 0x612   : > { %v1335_v11 = vsel %vm2465_vm1, %v1320_v37, %v1322_v23  ;;  %1556 = vmatprep.subr.msk.mxu1 %vm971_vm9, %v1322_v23  ;;  %1309 = vrot.lane.b32.xlu1 %v1251_v8, %s1663_s26  ;;  %vm2470_vm3 = vmmov %vm2466_vm0  ;;  %v1461_v8 = vunpack.c.l.bf16 %v1460_v22 }
 0x613   : > { %1287 = vrot.lane.b32.xlu0 %v1209_v28, %s1663_s26  ;;  %1557 = vmatpush1.msk.msra.mxu1 %vm971_vm9, %v1335_v11  ;;  %vm2467_vm9 = vmmov %vm2466_vm0 }
 0x614   : > { %vm2471_vm7 = vmmov %vm2466_vm0 }
 0x615   : > { %vm2472_vm6 = vmmov %vm2466_vm0 }
 0x616   : > { %1305 = vrot.lane.b32.xlu1 %v1249_v14, %s1663_s26  ;;  %vm2473_vm8 = vmmov %vm2466_vm0 }
 0x617   : > { %1275 = vrot.lane.b32.xlu0 %v983_v6, %s1663_s26  ;;  %vm2474_vm10 = vmmov %vm2466_vm0 }
 0x618   : > { %vm2475_vm12 = vmmov %vm2466_vm0 }
 0x619   : > { %vm2476_vm13 = vmmov %vm2466_vm0 }
 0x61a   : > { %1285 = vrot.lane.b32.xlu1 %v2225_v29, %s1663_s26  ;;  %v1284_v29 = vpop.permute.xlu0 %1283  ;;  %vm2477_vm4 = vmmov %vm2466_vm0 }
 0x61b   : > { %1271 = vrot.lane.b32.xlu0 %v2290_v38, %s1663_s26 }
 0x61e   : > { %1281 = vrot.lane.b32.xlu1 %v2221_v53, %s1663_s26 }
 0x622   : > { %1277 = vrot.lane.b32.xlu1 %v984_v16, %s1663_s26 }
 0x626   : > { %1273 = vrot.lane.b32.xlu1 %v2267_v2, %s1663_s26 }
 0x650   : > { %v1294_v38 = vpop.permute.xlu1 %1293 }
 0x660   : > { %v1290_v30 = vpop.permute.xlu1 %1289 }
 0x665   : > { %v1316_v10 = vpop.permute.xlu0 %1315 }
 0x669   : > { %v1312_v21 = vpop.permute.xlu0 %1311 }
 0x66d   : > { %v1308_v7 = vpop.permute.xlu0 %1307 }
 0x671   : > { %v1304_v43 = vpop.permute.xlu0 %1303 }
 0x674   : > { %v1302_v36 = vpop.permute.xlu1 %1301 }
 0x675   : > { %v1280_v34 = vpop.permute.xlu0 %1279 }
 0x678   : > { %v1298_v42 = vpop.permute.xlu1 %1297 }
 0x679   : > { %v1300_v39 = vpop.permute.xlu0 %1299 }
 0x67a   : > { %v1330_v19 = vsel %vm2470_vm3, %v1300_v39, %v1302_v36 }
 0x67c   : > { %v1318_v53 = vpop.permute.xlu1 %1317 }
 0x67d   : > { %v1334_v41 = vsel %vm2466_vm0, %v1316_v10, %v1318_v53  ;;  %1375 = vmatprep.subr.mxu1 %v1318_v53  ;;  %v1296_v55 = vpop.permute.xlu0 %1295 }
 0x67e   : > { %1376 = vmatpush1.msra.mxu1 %v1334_v41  ;;  %v1329_v5 = vsel %vm2471_vm7, %v1296_v55, %v1298_v42 }
 0x680   : > { %v1314_v50 = vpop.permute.xlu1 %1313 }
 0x681   : > { %v1333_v2 = vsel %vm2467_vm9, %v1312_v21, %v1314_v50  ;;  %1377 = vmatprep.subr.mxu1 %v1314_v50  ;;  %v1292_v31 = vpop.permute.xlu0 %1291 }
 0x682   : > { %1378 = vmatpush1.msra.mxu1 %v1333_v2  ;;  %v1328_v35 = vsel %vm2472_vm6, %v1292_v31, %v1294_v38 }
 0x684   : > { %v1310_v49 = vpop.permute.xlu1 %1309 }
 0x685   : > { %v1332_v48 = vsel %vm2468_vm11, %v1308_v7, %v1310_v49  ;;  %1379 = vmatprep.subr.mxu1 %v1310_v49  ;;  %v1288_v18 = vpop.permute.xlu0 %1287 }
 0x686   : > { %1380 = vmatpush1.msra.mxu1 %v1332_v48  ;;  %v1327_v51 = vsel %vm2473_vm8, %v1288_v18, %v1290_v30 }
 0x688   : > { %v1306_v33 = vpop.permute.xlu1 %1305 }
 0x689   : > { %v1331_v52 = vsel %vm2469_vm2, %v1304_v43, %v1306_v33  ;;  %1381 = vmatprep.subr.mxu1 %v1306_v33  ;;  %v1276_v60 = vpop.permute.xlu0 %1275 }
 0x68a   : > { %1382 = vmatpush1.msra.mxu1 %v1331_v52 }
 0x68b   : > { %1383 = vmatprep.subr.mxu1 %v1302_v36 }
 0x68c   : > { %1384 = vmatpush1.msra.mxu1 %v1330_v19  ;;  %v1286_v54 = vpop.permute.xlu1 %1285 }
 0x68d   : > { %1385 = vmatprep.subr.mxu1 %v1298_v42  ;;  %v1326_v45 = vsel %vm2474_vm10, %v1284_v29, %v1286_v54  ;;  %v1272_v26 = vpop.permute.xlu0 %1271 }
 0x68e   : > { %1386 = vmatpush1.msra.mxu1 %v1329_v5 }
 0x68f   : > { %1387 = vmatprep.subr.mxu1 %v1294_v38 }
 0x690   : > { %1388 = vmatpush1.msra.mxu1 %v1328_v35  ;;  %v1282_v44 = vpop.permute.xlu1 %1281 }
 0x691   : > { %1389 = vmatprep.subr.mxu1 %v1290_v30  ;;  %v1325_v63 = vsel %vm2475_vm12, %v1280_v34, %v1282_v44 }
 0x692   : > { %1390 = vmatpush1.msra.mxu1 %v1327_v51 }
 0x693   : > { %1391 = vmatprep.subr.mxu1 %v1286_v54 }
 0x694   : > { %1392 = vmatpush1.msra.mxu1 %v1326_v45  ;;  %v1278_v15 = vpop.permute.xlu1 %1277 }
 0x695   : > { %1393 = vmatprep.subr.mxu1 %v1282_v44  ;;  %v1324_v3 = vsel %vm2476_vm13, %v1276_v60, %v1278_v15 }
 0x696   : > { %1394 = vmatpush1.msra.mxu1 %v1325_v63 }
 0x697   : > { %1395 = vmatprep.subr.mxu1 %v1278_v15 }
 0x698   : > { %1396 = vmatpush1.msra.mxu1 %v1324_v3  ;;  %v1274_v61 = vpop.permute.xlu1 %1273 }
 0x699   : > { %v1323_v9 = vsel %vm2477_vm4, %v1272_v26, %v1274_v61  ;;  %1397 = vmatprep.subr.mxu1 %v1274_v61 }
 0x69a   : > { %1398 = vmatpush1.msra.mxu1 %v1323_v9 }
 0x69b   : > { %1558 = vmatmul.mubr.msk.f32.vlgmr.msra.gmra.mxu1 %vm1035_vm15, %v1265_v27  ;;  %vm2479_vm15 = vcmask 523264  }
 0x75b   : > { %v1433_v1 = vpop.f32.mrf.mxu1 }
 0x75c   : > { %v1559_v47 = vmul.f32 -1.442695, %v1433_v1 }
 0x75d   : > { %v1435_v4 = vpop.f32.mrf.mxu1 }
 0x75e   : > { %1636 = vpow2.f32 %v1559_v47  ;;  %v1560_v57 = vmul.f32 -1.442695, %v1435_v4 }
 0x760   : > { %1638 = vpow2.f32 %v1560_v57 }
 0x76b   : > { %v1637_v40 = vpop.eup %1636 }
 0x76c   : > { %v1444_v0 = vadd.f32 1.0, %v1637_v40 }
 0x76d   : > { %v1639_v58 = vpop.eup %1638 }
 0x76e   : > { %1640 = vrcp.f32 %v1444_v0  ;;  %v1445_v32 = vadd.f32 1.0, %v1639_v58 }
 0x770   : > { %1642 = vrcp.f32 %v1445_v32 }
 0x77b   : > { %v1641_v20 = vpop.eup %1640 }
 0x77c   : > { %v1453_v56 = vrot.slane %v1641_v20, %v1831_v46 }
 0x77d   : > { %v1643_v37 = vpop.eup %1642 }
 0x77e   : > { %v1458_v23 = vmul.f32 %v1453_v56, %v1899_v24  ;;  %v1457_v28 = vrot.slane %v1643_v37, %v1831_v46 }
 0x780   : > { %v1463_v11 = vadd.f32 %v1461_v8, %v1458_v23  ;;  %v1459_v12 = vmul.f32 %v1457_v28, %v1902_v25 }
 0x782   : > { %v1465_v17 = vmax.f32 %v1463_v11, 0.0  ;;  %v1464_v14 = vadd.f32 %v1462_v13, %v1459_v12 }
 0x784   : > { %1467 = vst [vmem:[%s435_s20] sm:$0xff] %v1465_v17  ;;  %v1466_v6 = vmax.f32 %v1464_v14, 0.0 }
 0x786   : > { %1468 = vst.msk [vmem:[%s435_s20 + $0x8] sm:$0xff] %vm2479_vm15, %v1466_v6 }
 0x787 PF: > { %s24_s23 = sadd.s32 1, %s1650_s23  }
 0x788   : > { %p21_p4 = scmp.ge.s32.totalorder %s24_s23, 4  }
 0x78a   :  { %23 = sbr.rel (!%p21_p4) target bundleno = 3 (0x3), region = 101 }

</bundles_post_ra>
